<compile_context>
chip_gen: v5e
topology: v5e:2x2
jax: 0.10.0
libtpu: 0.0.40
codegen_flags: <defaults>
</compile_context>

<pallas_src>
import functools
import math

import jax
import jax.numpy as jnp
from jax.experimental import pallas as pl
from jax.experimental.pallas import tpu as pltpu


# -----------------------------------------------------------------------------
# Helpers for tiling / VMEM budgeting.
# -----------------------------------------------------------------------------
def _round_up(x, m):
    return ((x + m - 1) // m) * m


def _vmem_capacity_bytes():
    try:
        info = pltpu.get_tpu_info()
        for name in ("vmem_capacity_bytes", "vmem_bytes", "vmem_size_bytes"):
            v = getattr(info, name, None)
            if v:
                return int(v)
    except Exception:
        pass
    return 64 << 20  # conservative default (v7x per-core VMEM)


def _choose_tiles(N, H, Dp, Dv, Cz, Dout, budget_bytes):
    """Largest query tile whose double-buffered working set fits the budget."""
    n_cap = max(8, _round_up(N, 8))
    for tq in (256, 128, 64, 32, 16, 8):
        if tq > n_cap:
            continue
        Np = _round_up(N, tq)
        db = 2 * (H * tq * Dp * 4            # qf block   (f32)
                  + H * Np * Dp * 4          # kf block   (f32)
                  + (tq + Np) * 4            # mask vectors
                  + H * tq * Np * 2          # bias block (bf16)
                  + H * Np * Dv * 2          # vcat block (bf16)
                  + tq * Np * Cz * 2         # z block    (bf16)
                  + tq * H * Dout * 4)       # output block (f32)
        scratch = (tq * _round_up(H, 8) * Np * 4      # p scratch (f32)
                   + tq * _round_up(H, 8) * Dv * 4    # o|o_pt scratch (f32)
                   + tq * H * Np * 2)                 # bf16 temp for o_pair matmul
        if db + scratch <= budget_bytes:
            return tq, Np
    return 8, _round_up(N, 8)


# -----------------------------------------------------------------------------
# Pallas kernel: all heads per (batch, query-tile) grid step.
# -----------------------------------------------------------------------------
def _ipa_attention_kernel(inf,
                          qf_ref,    # [1, H, tq, Dp]  f32  [a*q | sqrt(hw)*q_pts | qn | 1]
                          kf_ref,    # [1, H, Np, Dp]  f32  [k   | sqrt(hw)*k_pts | 1 | kn]
                          mcol_ref,  # [1, tq, 1]      f32  mask_i
                          mrow_ref,  # [1, 1,  Np]     f32  mask_j
                          bias_ref,  # [1, H, tq, Np]  bf16 sqrt(1/3)*pair bias
                          vcat_ref,  # [1, H, Np, Dv]  bf16 [v | v_pts(x,y,z)]
                          z_ref,     # [1, tq, Np, Cz] bf16
                          out_ref,   # [1, tq, H, Dout] f32  [o | o_pt | o_pair | 0-pad]
                          p_ref,     # [tq, H, Np] f32 scratch (query-major attn weights)
                          oc_ref):   # [tq, H, Dv] f32 scratch
    H = qf_ref.shape[1]
    tq = qf_ref.shape[2]
    Dv = vcat_ref.shape[3]
    Cz = z_ref.shape[3]
    Dout = out_ref.shape[3]

    # Square mask rebuilt once from the two 1-D mask vectors (cheap VPU
    # broadcast; kept out of the matmul so unmasked logits stay exactly 0).
    mask_term = inf * (mcol_ref[0] * mrow_ref[0] - 1.0)           # [tq, Np]

    # Per-head logits + softmax + [v | v_pts] aggregation (H is small, unroll).
    for h in range(H):
        # Fused scalar-QK + point-cross + |q_pts|^2/|k_pts|^2 logits as one
        # f32 MXU matmul with M = tq (expanded ||q-k||^2 is cancellation
        # sensitive, hence f32 on purpose).
        a = jax.lax.dot_general(qf_ref[0, h], kf_ref[0, h],
                                (((1,), (1,)), ((), ())),
                                preferred_element_type=jnp.float32)
        a = a + bias_ref[0, h].astype(jnp.float32) + mask_term
        # Softmax over keys; reciprocal goes to the EUP slot.
        a = a - jnp.max(a, axis=-1, keepdims=True)
        e = jnp.exp(a)
        p = e * pl.reciprocal(jnp.sum(e, axis=-1, keepdims=True), approx=True)

        # Stage attention weights query-major so o_pair can be one matmul with
        # M = H per query row (instead of M = 1).
        p_ref[:, h, :] = p
        # Fused [v | v_pts] aggregation: bf16 MXU matmul, M = tq.
        oc_ref[:, h, :] = jnp.dot(p.astype(jnp.bfloat16), vcat_ref[0, h],
                                  preferred_element_type=jnp.float32)

    # o_pair[i, h, c] = sum_j p[h, i, j] * z[i, j, c]: batched over the tq
    # query rows with M = H -> much better MXU row utilization than M = 1.
    p_all = p_ref[...].astype(jnp.bfloat16)                        # [tq, H, Np]
    opair = jax.lax.dot_general(p_all, z_ref[0],
                                (((2,), (1,)), ((0,), (0,))),
                                preferred_element_type=jnp.float32)  # [tq, H, Cz]

    pieces = [oc_ref[...], opair]
    pad = Dout - Dv - Cz
    if pad:
        pieces.append(jnp.zeros((tq, H, pad), jnp.float32))
    # One lane-dense [tq, H, Dout] store (Dout is a multiple of 128).
    out_ref[0] = jnp.concatenate(pieces, axis=-1)


def _ipa_attention_pallas(qf, kf, mcol, mrow, bias, vcat, z_bf16, *,
                          inf, tq, dout, vmem_limit):
    B, H, Np, Dp = qf.shape
    Dv = vcat.shape[-1]
    Cz = z_bf16.shape[-1]
    nq = Np // tq

    grid_spec = pltpu.PrefetchScalarGridSpec(
        num_scalar_prefetch=0,
        grid=(B, nq),
        in_specs=[
            pl.BlockSpec((1, H, tq, Dp),   lambda b, qi: (b, 0, qi, 0)),   # qf
            pl.BlockSpec((1, H, Np, Dp),   lambda b, qi: (b, 0, 0, 0)),    # kf
            pl.BlockSpec((1, tq, 1),       lambda b, qi: (b, qi, 0)),      # mask_i
            pl.BlockSpec((1, 1, Np),       lambda b, qi: (b, 0, 0)),       # mask_j
            pl.BlockSpec((1, H, tq, Np),   lambda b, qi: (b, 0, qi, 0)),   # bias
            pl.BlockSpec((1, H, Np, Dv),   lambda b, qi: (b, 0, 0, 0)),    # vcat
            # z depends only on (b, qi): DMA'd exactly once per grid step and
            # reused for every head.
            pl.BlockSpec((1, tq, Np, Cz),  lambda b, qi: (b, qi, 0, 0)),   # z
        ],
        out_specs=pl.BlockSpec((1, tq, H, dout), lambda b, qi: (b, qi, 0, 0)),
        scratch_shapes=[pltpu.VMEM((tq, H, Np), jnp.float32),
                        pltpu.VMEM((tq, H, Dv), jnp.float32)],
    )
    return pl.pallas_call(
        functools.partial(_ipa_attention_kernel, inf),
        grid_spec=grid_spec,
        out_shape=jax.ShapeDtypeStruct((B, Np, H, dout), jnp.float32),
        compiler_params=pltpu.CompilerParams(
            dimension_semantics=("parallel", "parallel"),
            vmem_limit_bytes=vmem_limit),
    )(qf, kf, mcol, mrow, bias, vcat, z_bf16)


# -----------------------------------------------------------------------------
# Glue: parameter init, projection linears, rigid transforms, output linear.
# The attention hot path (logits/softmax/aggregations over the N^2 streams)
# runs in the Pallas kernel; the small per-residue projections stay in XLA.
# -----------------------------------------------------------------------------
def _linear(x, W, b=None):
    y = jnp.einsum('...i,oi->...o', x, W)
    if b is not None:
        y = y + b
    return y


def init_ipa_params(key, c_s, c_z, c_hidden, no_heads, no_qk_points, no_v_points):
    H, C, Pq, Pv = no_heads, c_hidden, no_qk_points, no_v_points
    concat_out_dim = H * (c_z + C + Pv * 4)
    keys = jax.random.split(key, 8)

    def w(k, o, i, scale=0.02):
        return scale * jax.random.normal(k, (o, i), dtype=jnp.float32)

    return {
        "W_q":   w(keys[0], H * C, c_s),
        "b_q":   jnp.zeros((H * C,), jnp.float32),
        "W_kv":  w(keys[1], 2 * H * C, c_s),
        "b_kv":  jnp.zeros((2 * H * C,), jnp.float32),
        "W_qp":  w(keys[2], H * Pq * 3, c_s),
        "b_qp":  0.01 * jax.random.normal(keys[3], (H * Pq * 3,), jnp.float32),
        "W_kvp": w(keys[4], H * (Pq + Pv) * 3, c_s),
        "b_kvp": 0.01 * jax.random.normal(keys[5], (H * (Pq + Pv) * 3,), jnp.float32),
        "W_b":   w(keys[6], H, c_z),
        "b_b":   jnp.zeros((H,), jnp.float32),
        # ipa_point_weights_init_: softplus^{-1}(1.0)
        "head_weights": jnp.full((H,), math.log(math.e - 1.0), jnp.float32),
        # linear_out has init='final' (zeros) in AlphaFold; small random values
        # here so the synthetic output is non-trivial.
        "W_out": w(keys[7], c_s, concat_out_dim),
        "b_out": jnp.zeros((c_s,), jnp.float32),
    }


def _project(params, s, rot, trans, *, c_hidden, no_heads, no_qk_points,
             no_v_points):
    B, N, _ = s.shape
    H, C, Pq, Pv = no_heads, c_hidden, no_qk_points, no_v_points

    q = _linear(s, params['W_q'], params['b_q']).reshape(B, N, H, C)
    kv = _linear(s, params['W_kv'], params['b_kv']).reshape(B, N, H, 2 * C)
    k, v = kv[..., :C], kv[..., C:]

    def to_points(flat, npts):
        # torch.split into 3 coord chunks, stack(dim=-1), rigid apply, reshape
        pts = jnp.stack(jnp.split(flat, 3, axis=-1), axis=-1)        # [B,N,H*npts,3]
        pts = jnp.einsum('bnij,bnmj->bnmi', rot, pts) + trans[:, :, None, :]
        return pts.reshape(B, N, H, npts, 3)

    q_pts = to_points(_linear(s, params['W_qp'], params['b_qp']), Pq)
    kv_pts = to_points(_linear(s, params['W_kvp'], params['b_kvp']), Pq + Pv)
    k_pts, v_pts = kv_pts[..., :Pq, :], kv_pts[..., Pq:, :]
    return q, k, v, q_pts, k_pts, v_pts


def invariant_point_attention(params, s, z, rot, trans, mask, *,
                              c_hidden, no_heads, no_qk_points, no_v_points,
                              inf=1e5, eps=1e-8):
    B, N, _ = s.shape
    Cz = z.shape[-1]
    H, C, Pq, Pv = no_heads, c_hidden, no_qk_points, no_v_points

    q, k, v, q_pts, k_pts, v_pts = _project(
        params, s, rot, trans, c_hidden=C, no_heads=H,
        no_qk_points=Pq, no_v_points=Pv)

    hw = jax.nn.softplus(params['head_weights']) * math.sqrt(
        1.0 / (3.0 * (Pq * 9.0 / 2.0)))                              # [H]
    sqrt_hw = jnp.sqrt(hw)[None, :, None, None]
    alpha = math.sqrt(1.0 / (3.0 * C))

    hm = lambda x: jnp.transpose(x, (0, 2, 1, 3))                    # [B,N,H,X]->[B,H,N,X]
    q_h, k_h, v_h = hm(q), hm(k), hm(v)
    qp = jnp.transpose(q_pts, (0, 2, 1, 3, 4)).reshape(B, H, N, Pq * 3)
    kp = jnp.transpose(k_pts, (0, 2, 1, 3, 4)).reshape(B, H, N, Pq * 3)
    vp = jnp.transpose(v_pts, (0, 2, 1, 3, 4)).reshape(B, H, N, Pv * 3)
    qps, kps = qp * sqrt_hw, kp * sqrt_hw

    Dp = C + 3 * Pq + 2                      # fused-logit operand width
    Dv = C + 3 * Pv                          # fused [v | v_pts] width
    Dout = _round_up(Dv + Cz, 128)           # lane-dense output block width

    cap = _vmem_capacity_bytes()
    vmem_limit = int(min(max(int(cap * 0.8), 32 << 20), 100 << 20))
    tq, Np = _choose_tiles(N, H, Dp, Dv, Cz, Dout, vmem_limit - (4 << 20))

    pad_n = Np - N

    def padn(x, axes):
        if pad_n == 0:
            return x
        widths = [(0, 0)] * x.ndim
        for ax in axes:
            widths[ax] = (0, pad_n)
        return jnp.pad(x, widths)

    mask_p = padn(mask.astype(jnp.float32), [1])                     # [B, Np]
    q_h, k_h, v_h = padn(q_h, [2]), padn(k_h, [2]), padn(v_h, [2])
    qps, kps, vp = padn(qps, [2]), padn(kps, [2]), padn(vp, [2])

    # Fused logit operands: mm(qf, kf^T) = alpha*(q.k) + hw*sum_p q_p.k_p
    # - 0.5*hw*(|q_p|^2 + |k_p|^2)   (qn / kn folded in as extra columns).
    ones = jnp.ones((B, H, Np, 1), jnp.float32)
    qn = -0.5 * jnp.sum(qps * qps, axis=-1, keepdims=True)
    kn = -0.5 * jnp.sum(kps * kps, axis=-1, keepdims=True)
    qf = jnp.concatenate([alpha * q_h, qps, qn, ones], axis=-1)      # [B,H,Np,Dp]
    kf = jnp.concatenate([k_h, kps, ones, kn], axis=-1)              # [B,H,Np,Dp]
    vcat = jnp.concatenate([v_h, vp], axis=-1).astype(jnp.bfloat16)  # [B,H,Np,Dv]

    mcol = mask_p[:, :, None]                                        # [B,Np,1]
    mrow = mask_p[:, None, :]                                        # [B,1,Np]

    zp = padn(z, [1, 2])
    z_bf = zp.astype(jnp.bfloat16)
    # Pair bias produced head-major bf16 in one fused einsum (no separate
    # transpose/cast passes over the N^2*H tensor).
    bias = (math.sqrt(1.0 / 3.0)
            * (jnp.einsum('bijc,hc->bhij', zp, params['W_b'])
               + params['b_b'][None, :, None, None])).astype(jnp.bfloat16)

    out = _ipa_attention_pallas(qf, kf, mcol, mrow, bias, vcat, z_bf,
                                inf=inf, tq=tq, dout=Dout,
                                vmem_limit=vmem_limit)
    out = out[:, :N]                                                 # [B,N,H,Dout]
    ocat = out[..., :Dv]
    o = ocat[..., :C].reshape(B, N, H * C)
    o_pt_g = ocat[..., C:].reshape(B, N, H, Pv, 3)
    o_pair = out[..., Dv:Dv + Cz].reshape(B, N, H * Cz)

    # rigid invert_apply: R^T (x - t)
    o_pt = jnp.einsum('bnji,bnhpj->bnhpi', rot,
                      o_pt_g - trans[:, :, None, None, :])
    o_pt_norm = jnp.sqrt(jnp.sum(o_pt ** 2, axis=-1) + eps).reshape(B, N, H * Pv)
    o_pt_flat = o_pt.reshape(B, N, H * Pv, 3)

    cat = jnp.concatenate(
        [o, o_pt_flat[..., 0], o_pt_flat[..., 1], o_pt_flat[..., 2],
         o_pt_norm, o_pair], axis=-1)
    return _linear(cat, params['W_out'], params['b_out'])


# -----------------------------------------------------------------------------
# Pure-JAX f32 reference (mirrors the PyTorch forward) for verification.
# -----------------------------------------------------------------------------
def ipa_reference(params, s, z, rot, trans, mask, *,
                  c_hidden, no_heads, no_qk_points, no_v_points,
                  inf=1e5, eps=1e-8):
    B, N, _ = s.shape
    Cz = z.shape[-1]
    H, C, Pq, Pv = no_heads, c_hidden, no_qk_points, no_v_points

    q, k, v, q_pts, k_pts, v_pts = _project(
        params, s, rot, trans, c_hidden=C, no_heads=H,
        no_qk_points=Pq, no_v_points=Pv)
    bias = _linear(z, params['W_b'], params['b_b'])                  # [B,N,N,H]

    a = jnp.einsum('bihc,bjhc->bhij', q, k) * math.sqrt(1.0 / (3.0 * C))
    a = a + math.sqrt(1.0 / 3.0) * jnp.transpose(bias, (0, 3, 1, 2))

    diff = q_pts[:, :, None] - k_pts[:, None]                        # [B,N,N,H,P,3]
    pt_att = jnp.sum(diff ** 2, axis=-1)                             # [B,N,N,H,P]
    hw = jax.nn.softplus(params['head_weights']) * math.sqrt(
        1.0 / (3.0 * (Pq * 9.0 / 2.0)))
    pt_att = jnp.sum(pt_att * hw[None, None, None, :, None], axis=-1) * (-0.5)

    sq_mask = inf * (mask[:, :, None] * mask[:, None, :] - 1.0)
    a = a + jnp.transpose(pt_att, (0, 3, 1, 2)) + sq_mask[:, None]
    a = jax.nn.softmax(a, axis=-1)

    o = jnp.einsum('bhij,bjhc->bihc', a, v).reshape(B, N, H * C)
    o_pt = jnp.einsum('bhij,bjhpx->bihpx', a, v_pts)
    o_pt = jnp.einsum('bnji,bnhpj->bnhpi', rot,
                      o_pt - trans[:, :, None, None, :])
    o_pt_norm = jnp.sqrt(jnp.sum(o_pt ** 2, axis=-1) + eps).reshape(B, N, H * Pv)
    o_pt_flat = o_pt.reshape(B, N, H * Pv, 3)
    o_pair = jnp.einsum('bhij,bijc->bihc', a, z).reshape(B, N, H * Cz)

    cat = jnp.concatenate(
        [o, o_pt_flat[..., 0], o_pt_flat[..., 1], o_pt_flat[..., 2],
         o_pt_norm, o_pair], axis=-1)
    return _linear(cat, params['W_out'], params['b_out'])


def _random_rotations(key, shape):
    quat = jax.random.normal(key, shape + (4,), jnp.float32)
    quat = quat / jnp.linalg.norm(quat, axis=-1, keepdims=True)
    w, x, y, z = (quat[..., i] for i in range(4))
    r00 = 1 - 2 * (y * y + z * z); r01 = 2 * (x * y - w * z); r02 = 2 * (x * z + w * y)
    r10 = 2 * (x * y + w * z); r11 = 1 - 2 * (x * x + z * z); r12 = 2 * (y * z - w * x)
    r20 = 2 * (x * z - w * y); r21 = 2 * (y * z + w * x); r22 = 1 - 2 * (x * x + y * y)
    return jnp.stack([jnp.stack([r00, r01, r02], -1),
                      jnp.stack([r10, r11, r12], -1),
                      jnp.stack([r20, r21, r22], -1)], -2)


if __name__ == "__main__":
    B, N = 2, 16
    c_s, c_z = 32, 16
    c_hidden, no_heads = 16, 4
    no_qk_points, no_v_points = 4, 8

    key = jax.random.PRNGKey(0)
    k_param, k_s, k_z, k_rot, k_t, k_m = jax.random.split(key, 6)

    params = init_ipa_params(k_param, c_s, c_z, c_hidden, no_heads,
                             no_qk_points, no_v_points)

    s = jax.random.normal(k_s, (B, N, c_s), jnp.float32)
    z = jax.random.normal(k_z, (B, N, N, c_z), jnp.float32)
    rot = _random_rotations(k_rot, (B, N))
    trans = jax.random.normal(k_t, (B, N, 3), jnp.float32)
    mask = (jax.random.uniform(k_m, (B, N)) > 0.15).astype(jnp.float32)

    kw = dict(c_hidden=c_hidden, no_heads=no_heads,
              no_qk_points=no_qk_points, no_v_points=no_v_points)

    ipa = jax.jit(functools.partial(invariant_point_attention, **kw))
    out = jax.block_until_ready(ipa(params, s, z, rot, trans, mask))

    ref = jax.block_until_ready(
        ipa_reference(params, s, z, rot, trans, mask, **kw))

    assert out.shape == (B, N, c_s)
    assert bool(jnp.all(jnp.isfinite(out)))
    # Kernel feeds z / bias / value streams in bf16 and uses the EUP approx
    # reciprocal in the softmax; compare against the pure-f32 reference with a
    # correspondingly relaxed (but still tight) tolerance.
    err = float(jnp.max(jnp.abs(out - ref)))
    assert err < 3e-2, f"max abs error vs reference: {err}"
    print("KERNEL_OK")
</pallas_src>

<mosaic_0001>
module attributes {stable_mosaic.version = 11 : i64} {
  func.func @_ipa_attention_kernel(%arg0: i32, %arg1: i32, %arg2: memref<1x4x16x30xf32, #tpu.memory_space<vmem>>, %arg3: memref<1x4x16x30xf32, #tpu.memory_space<vmem>>, %arg4: memref<1x16x1xf32, #tpu.memory_space<vmem>>, %arg5: memref<1x1x16xf32, #tpu.memory_space<vmem>>, %arg6: memref<1x4x16x16xbf16, #tpu.memory_space<vmem>>, %arg7: memref<1x4x16x40xbf16, #tpu.memory_space<vmem>>, %arg8: memref<1x16x16x16xbf16, #tpu.memory_space<vmem>>, %arg9: memref<1x16x4x128xf32, #tpu.memory_space<vmem>>, %arg10: memref<16x4x16xf32, #tpu.memory_space<vmem>>, %arg11: memref<16x4x40xf32, #tpu.memory_space<vmem>>) attributes {dimension_semantics = [#tpu.dimension_semantics<parallel>, #tpu.dimension_semantics<parallel>], iteration_bounds = array<i64: 2, 1>, scalar_prefetch = 0 : i64, scratch_operands = 2 : i64, tpu.core_type = #tpu.core_type<tc>, window_params = [{transform_indices = @transform_0, window_bounds = array<i64: 1, 4, 16, 30>}, {transform_indices = @transform_1, window_bounds = array<i64: 1, 4, 16, 30>}, {transform_indices = @transform_2, window_bounds = array<i64: 1, 16, 1>}, {transform_indices = @transform_3, window_bounds = array<i64: 1, 1, 16>}, {transform_indices = @transform_4, window_bounds = array<i64: 1, 4, 16, 16>}, {transform_indices = @transform_5, window_bounds = array<i64: 1, 4, 16, 40>}, {transform_indices = @transform_6, window_bounds = array<i64: 1, 16, 16, 16>}, {transform_indices = @transform_7, window_bounds = array<i64: 1, 16, 4, 128>}]} {
    %c0 = arith.constant 0 : index
    %c0_0 = arith.constant 0 : index
    %c0_1 = arith.constant 0 : index
    %0 = vector.load %arg4[%c0, %c0_0, %c0_1] : memref<1x16x1xf32, #tpu.memory_space<vmem>>, vector<1x16x1xf32>
    %1 = vector.shape_cast %0 : vector<1x16x1xf32> to vector<16x1xf32>
    %c0_2 = arith.constant 0 : index
    %c0_3 = arith.constant 0 : index
    %c0_4 = arith.constant 0 : index
    %2 = vector.load %arg5[%c0_2, %c0_3, %c0_4] : memref<1x1x16xf32, #tpu.memory_space<vmem>>, vector<1x1x16xf32>
    %3 = vector.shape_cast %2 : vector<1x1x16xf32> to vector<1x16xf32>
    %4 = vector.broadcast %1 : vector<16x1xf32> to vector<16x16xf32>
    %5 = vector.broadcast %3 : vector<1x16xf32> to vector<16x16xf32>
    %6 = arith.mulf %4, %5 : vector<16x16xf32>
    %cst = arith.constant 1.000000e+00 : f32
    %7 = vector.broadcast %cst : f32 to vector<16x16xf32>
    %8 = arith.subf %6, %7 : vector<16x16xf32>
    %cst_5 = arith.constant 1.000000e+05 : f32
    %9 = vector.broadcast %cst_5 : f32 to vector<16x16xf32>
    %10 = arith.mulf %9, %8 : vector<16x16xf32>
    %c0_6 = arith.constant 0 : index
    %c0_7 = arith.constant 0 : index
    %c0_8 = arith.constant 0 : index
    %c0_9 = arith.constant 0 : index
    %11 = vector.load %arg2[%c0_6, %c0_7, %c0_8, %c0_9] : memref<1x4x16x30xf32, #tpu.memory_space<vmem>>, vector<1x1x16x30xf32>
    %12 = vector.shape_cast %11 : vector<1x1x16x30xf32> to vector<16x30xf32>
    %c0_10 = arith.constant 0 : index
    %c0_11 = arith.constant 0 : index
    %c0_12 = arith.constant 0 : index
    %c0_13 = arith.constant 0 : index
    %13 = vector.load %arg3[%c0_10, %c0_11, %c0_12, %c0_13] : memref<1x4x16x30xf32, #tpu.memory_space<vmem>>, vector<1x1x16x30xf32>
    %14 = vector.shape_cast %13 : vector<1x1x16x30xf32> to vector<16x30xf32>
    %cst_14 = arith.constant dense<0.000000e+00> : vector<16x16xf32>
    %15 = tpu.matmul %12, %14, %cst_14 {dimension_numbers = #tpu.dot_dimension_numbers<[1], [1], [0], [0], [0, 0, 1, 0], [], []>} : vector<16x30xf32>, vector<16x30xf32>, vector<16x16xf32> -> vector<16x16xf32>
    %c0_15 = arith.constant 0 : index
    %c0_16 = arith.constant 0 : index
    %c0_17 = arith.constant 0 : index
    %c0_18 = arith.constant 0 : index
    %16 = vector.load %arg6[%c0_15, %c0_16, %c0_17, %c0_18] : memref<1x4x16x16xbf16, #tpu.memory_space<vmem>>, vector<1x1x16x16xbf16>
    %17 = vector.shape_cast %16 : vector<1x1x16x16xbf16> to vector<16x16xbf16>
    %18 = arith.extf %17 : vector<16x16xbf16> to vector<16x16xf32>
    %19 = arith.addf %15, %18 : vector<16x16xf32>
    %20 = arith.addf %19, %10 : vector<16x16xf32>
    %cst_19 = arith.constant dense<0xFF800000> : vector<16xf32>
    %21 = vector.multi_reduction <maximumf>, %20, %cst_19 [1] : vector<16x16xf32> to vector<16xf32>
    %22 = vector.shape_cast %21 : vector<16xf32> to vector<16x1xf32>
    %23 = vector.broadcast %22 : vector<16x1xf32> to vector<16x16xf32>
    %24 = arith.subf %20, %23 : vector<16x16xf32>
    %25 = math.exp %24 : vector<16x16xf32>
    %cst_20 = arith.constant dense<0.000000e+00> : vector<16xf32>
    %26 = vector.multi_reduction <add>, %25, %cst_20 [1] : vector<16x16xf32> to vector<16xf32>
    %27 = vector.shape_cast %26 : vector<16xf32> to vector<16x1xf32>
    %28 = tpu.reciprocal %27 {approx = true} : vector<16x1xf32> -> vector<16x1xf32>
    %29 = vector.broadcast %28 : vector<16x1xf32> to vector<16x16xf32>
    %30 = arith.mulf %25, %29 : vector<16x16xf32>
    %c0_21 = arith.constant 0 : index
    %c0_22 = arith.constant 0 : index
    %c0_23 = arith.constant 0 : index
    %31 = vector.load %arg10[%c0_21, %c0_22, %c0_23] : memref<16x4x16xf32, #tpu.memory_space<vmem>>, vector<16x1x16xf32>
    %32 = vector.shape_cast %31 : vector<16x1x16xf32> to vector<16x16xf32>
    %33 = vector.shape_cast %30 : vector<16x16xf32> to vector<16x1x16xf32>
    tpu.vector_store %arg10[%c0_21, %c0_22, %c0_23], %33 {strides = array<i32>} : memref<16x4x16xf32, #tpu.memory_space<vmem>>, vector<16x1x16xf32>,
    %34 = arith.truncf %30 : vector<16x16xf32> to vector<16x16xbf16>
    %c0_24 = arith.constant 0 : index
    %c0_25 = arith.constant 0 : index
    %c0_26 = arith.constant 0 : index
    %c0_27 = arith.constant 0 : index
    %35 = vector.load %arg7[%c0_24, %c0_25, %c0_26, %c0_27] : memref<1x4x16x40xbf16, #tpu.memory_space<vmem>>, vector<1x1x16x40xbf16>
    %36 = vector.shape_cast %35 : vector<1x1x16x40xbf16> to vector<16x40xbf16>
    %cst_28 = arith.constant dense<0.000000e+00> : vector<16x40xf32>
    %37 = tpu.matmul %34, %36, %cst_28 {dimension_numbers = #tpu.dot_dimension_numbers<[1], [0], [0], [1], [0, 0, 1, 1], [], []>} : vector<16x16xbf16>, vector<16x40xbf16>, vector<16x40xf32> -> vector<16x40xf32>
    %c0_29 = arith.constant 0 : index
    %c0_30 = arith.constant 0 : index
    %c0_31 = arith.constant 0 : index
    %38 = vector.load %arg11[%c0_29, %c0_30, %c0_31] : memref<16x4x40xf32, #tpu.memory_space<vmem>>, vector<16x1x40xf32>
    %39 = vector.shape_cast %38 : vector<16x1x40xf32> to vector<16x40xf32>
    %40 = vector.shape_cast %37 : vector<16x40xf32> to vector<16x1x40xf32>
    tpu.vector_store %arg11[%c0_29, %c0_30, %c0_31], %40 {strides = array<i32>} : memref<16x4x40xf32, #tpu.memory_space<vmem>>, vector<16x1x40xf32>,
    %c0_32 = arith.constant 0 : index
    %c1 = arith.constant 1 : index
    %c0_33 = arith.constant 0 : index
    %c0_34 = arith.constant 0 : index
    %41 = vector.load %arg2[%c0_32, %c1, %c0_33, %c0_34] : memref<1x4x16x30xf32, #tpu.memory_space<vmem>>, vector<1x1x16x30xf32>
    %42 = vector.shape_cast %41 : vector<1x1x16x30xf32> to vector<16x30xf32>
    %c0_35 = arith.constant 0 : index
    %c1_36 = arith.constant 1 : index
    %c0_37 = arith.constant 0 : index
    %c0_38 = arith.constant 0 : index
    %43 = vector.load %arg3[%c0_35, %c1_36, %c0_37, %c0_38] : memref<1x4x16x30xf32, #tpu.memory_space<vmem>>, vector<1x1x16x30xf32>
    %44 = vector.shape_cast %43 : vector<1x1x16x30xf32> to vector<16x30xf32>
    %cst_39 = arith.constant dense<0.000000e+00> : vector<16x16xf32>
    %45 = tpu.matmul %42, %44, %cst_39 {dimension_numbers = #tpu.dot_dimension_numbers<[1], [1], [0], [0], [0, 0, 1, 0], [], []>} : vector<16x30xf32>, vector<16x30xf32>, vector<16x16xf32> -> vector<16x16xf32>
    %c0_40 = arith.constant 0 : index
    %c1_41 = arith.constant 1 : index
    %c0_42 = arith.constant 0 : index
    %c0_43 = arith.constant 0 : index
    %46 = vector.load %arg6[%c0_40, %c1_41, %c0_42, %c0_43] : memref<1x4x16x16xbf16, #tpu.memory_space<vmem>>, vector<1x1x16x16xbf16>
    %47 = vector.shape_cast %46 : vector<1x1x16x16xbf16> to vector<16x16xbf16>
    %48 = arith.extf %47 : vector<16x16xbf16> to vector<16x16xf32>
    %49 = arith.addf %45, %48 : vector<16x16xf32>
    %50 = arith.addf %49, %10 : vector<16x16xf32>
    %cst_44 = arith.constant dense<0xFF800000> : vector<16xf32>
    %51 = vector.multi_reduction <maximumf>, %50, %cst_44 [1] : vector<16x16xf32> to vector<16xf32>
    %52 = vector.shape_cast %51 : vector<16xf32> to vector<16x1xf32>
    %53 = vector.broadcast %52 : vector<16x1xf32> to vector<16x16xf32>
    %54 = arith.subf %50, %53 : vector<16x16xf32>
    %55 = math.exp %54 : vector<16x16xf32>
    %cst_45 = arith.constant dense<0.000000e+00> : vector<16xf32>
    %56 = vector.multi_reduction <add>, %55, %cst_45 [1] : vector<16x16xf32> to vector<16xf32>
    %57 = vector.shape_cast %56 : vector<16xf32> to vector<16x1xf32>
    %58 = tpu.reciprocal %57 {approx = true} : vector<16x1xf32> -> vector<16x1xf32>
    %59 = vector.broadcast %58 : vector<16x1xf32> to vector<16x16xf32>
    %60 = arith.mulf %55, %59 : vector<16x16xf32>
    %c0_46 = arith.constant 0 : index
    %c1_47 = arith.constant 1 : index
    %c0_48 = arith.constant 0 : index
    %61 = vector.load %arg10[%c0_46, %c1_47, %c0_48] : memref<16x4x16xf32, #tpu.memory_space<vmem>>, vector<16x1x16xf32>
    %62 = vector.shape_cast %61 : vector<16x1x16xf32> to vector<16x16xf32>
    %63 = vector.shape_cast %60 : vector<16x16xf32> to vector<16x1x16xf32>
    tpu.vector_store %arg10[%c0_46, %c1_47, %c0_48], %63 {strides = array<i32>} : memref<16x4x16xf32, #tpu.memory_space<vmem>>, vector<16x1x16xf32>,
    %64 = arith.truncf %60 : vector<16x16xf32> to vector<16x16xbf16>
    %c0_49 = arith.constant 0 : index
    %c1_50 = arith.constant 1 : index
    %c0_51 = arith.constant 0 : index
    %c0_52 = arith.constant 0 : index
    %65 = vector.load %arg7[%c0_49, %c1_50, %c0_51, %c0_52] : memref<1x4x16x40xbf16, #tpu.memory_space<vmem>>, vector<1x1x16x40xbf16>
    %66 = vector.shape_cast %65 : vector<1x1x16x40xbf16> to vector<16x40xbf16>
    %cst_53 = arith.constant dense<0.000000e+00> : vector<16x40xf32>
    %67 = tpu.matmul %64, %66, %cst_53 {dimension_numbers = #tpu.dot_dimension_numbers<[1], [0], [0], [1], [0, 0, 1, 1], [], []>} : vector<16x16xbf16>, vector<16x40xbf16>, vector<16x40xf32> -> vector<16x40xf32>
    %c0_54 = arith.constant 0 : index
    %c1_55 = arith.constant 1 : index
    %c0_56 = arith.constant 0 : index
    %68 = vector.load %arg11[%c0_54, %c1_55, %c0_56] : memref<16x4x40xf32, #tpu.memory_space<vmem>>, vector<16x1x40xf32>
    %69 = vector.shape_cast %68 : vector<16x1x40xf32> to vector<16x40xf32>
    %70 = vector.shape_cast %67 : vector<16x40xf32> to vector<16x1x40xf32>
    tpu.vector_store %arg11[%c0_54, %c1_55, %c0_56], %70 {strides = array<i32>} : memref<16x4x40xf32, #tpu.memory_space<vmem>>, vector<16x1x40xf32>,
    %c0_57 = arith.constant 0 : index
    %c2 = arith.constant 2 : index
    %c0_58 = arith.constant 0 : index
    %c0_59 = arith.constant 0 : index
    %71 = vector.load %arg2[%c0_57, %c2, %c0_58, %c0_59] : memref<1x4x16x30xf32, #tpu.memory_space<vmem>>, vector<1x1x16x30xf32>
    %72 = vector.shape_cast %71 : vector<1x1x16x30xf32> to vector<16x30xf32>
    %c0_60 = arith.constant 0 : index
    %c2_61 = arith.constant 2 : index
    %c0_62 = arith.constant 0 : index
    %c0_63 = arith.constant 0 : index
    %73 = vector.load %arg3[%c0_60, %c2_61, %c0_62, %c0_63] : memref<1x4x16x30xf32, #tpu.memory_space<vmem>>, vector<1x1x16x30xf32>
    %74 = vector.shape_cast %73 : vector<1x1x16x30xf32> to vector<16x30xf32>
    %cst_64 = arith.constant dense<0.000000e+00> : vector<16x16xf32>
    %75 = tpu.matmul %72, %74, %cst_64 {dimension_numbers = #tpu.dot_dimension_numbers<[1], [1], [0], [0], [0, 0, 1, 0], [], []>} : vector<16x30xf32>, vector<16x30xf32>, vector<16x16xf32> -> vector<16x16xf32>
    %c0_65 = arith.constant 0 : index
    %c2_66 = arith.constant 2 : index
    %c0_67 = arith.constant 0 : index
    %c0_68 = arith.constant 0 : index
    %76 = vector.load %arg6[%c0_65, %c2_66, %c0_67, %c0_68] : memref<1x4x16x16xbf16, #tpu.memory_space<vmem>>, vector<1x1x16x16xbf16>
    %77 = vector.shape_cast %76 : vector<1x1x16x16xbf16> to vector<16x16xbf16>
    %78 = arith.extf %77 : vector<16x16xbf16> to vector<16x16xf32>
    %79 = arith.addf %75, %78 : vector<16x16xf32>
    %80 = arith.addf %79, %10 : vector<16x16xf32>
    %cst_69 = arith.constant dense<0xFF800000> : vector<16xf32>
    %81 = vector.multi_reduction <maximumf>, %80, %cst_69 [1] : vector<16x16xf32> to vector<16xf32>
    %82 = vector.shape_cast %81 : vector<16xf32> to vector<16x1xf32>
    %83 = vector.broadcast %82 : vector<16x1xf32> to vector<16x16xf32>
    %84 = arith.subf %80, %83 : vector<16x16xf32>
    %85 = math.exp %84 : vector<16x16xf32>
    %cst_70 = arith.constant dense<0.000000e+00> : vector<16xf32>
    %86 = vector.multi_reduction <add>, %85, %cst_70 [1] : vector<16x16xf32> to vector<16xf32>
    %87 = vector.shape_cast %86 : vector<16xf32> to vector<16x1xf32>
    %88 = tpu.reciprocal %87 {approx = true} : vector<16x1xf32> -> vector<16x1xf32>
    %89 = vector.broadcast %88 : vector<16x1xf32> to vector<16x16xf32>
    %90 = arith.mulf %85, %89 : vector<16x16xf32>
    %c0_71 = arith.constant 0 : index
    %c2_72 = arith.constant 2 : index
    %c0_73 = arith.constant 0 : index
    %91 = vector.load %arg10[%c0_71, %c2_72, %c0_73] : memref<16x4x16xf32, #tpu.memory_space<vmem>>, vector<16x1x16xf32>
    %92 = vector.shape_cast %91 : vector<16x1x16xf32> to vector<16x16xf32>
    %93 = vector.shape_cast %90 : vector<16x16xf32> to vector<16x1x16xf32>
    tpu.vector_store %arg10[%c0_71, %c2_72, %c0_73], %93 {strides = array<i32>} : memref<16x4x16xf32, #tpu.memory_space<vmem>>, vector<16x1x16xf32>,
    %94 = arith.truncf %90 : vector<16x16xf32> to vector<16x16xbf16>
    %c0_74 = arith.constant 0 : index
    %c2_75 = arith.constant 2 : index
    %c0_76 = arith.constant 0 : index
    %c0_77 = arith.constant 0 : index
    %95 = vector.load %arg7[%c0_74, %c2_75, %c0_76, %c0_77] : memref<1x4x16x40xbf16, #tpu.memory_space<vmem>>, vector<1x1x16x40xbf16>
    %96 = vector.shape_cast %95 : vector<1x1x16x40xbf16> to vector<16x40xbf16>
    %cst_78 = arith.constant dense<0.000000e+00> : vector<16x40xf32>
    %97 = tpu.matmul %94, %96, %cst_78 {dimension_numbers = #tpu.dot_dimension_numbers<[1], [0], [0], [1], [0, 0, 1, 1], [], []>} : vector<16x16xbf16>, vector<16x40xbf16>, vector<16x40xf32> -> vector<16x40xf32>
    %c0_79 = arith.constant 0 : index
    %c2_80 = arith.constant 2 : index
    %c0_81 = arith.constant 0 : index
    %98 = vector.load %arg11[%c0_79, %c2_80, %c0_81] : memref<16x4x40xf32, #tpu.memory_space<vmem>>, vector<16x1x40xf32>
    %99 = vector.shape_cast %98 : vector<16x1x40xf32> to vector<16x40xf32>
    %100 = vector.shape_cast %97 : vector<16x40xf32> to vector<16x1x40xf32>
    tpu.vector_store %arg11[%c0_79, %c2_80, %c0_81], %100 {strides = array<i32>} : memref<16x4x40xf32, #tpu.memory_space<vmem>>, vector<16x1x40xf32>,
    %c0_82 = arith.constant 0 : index
    %c3 = arith.constant 3 : index
    %c0_83 = arith.constant 0 : index
    %c0_84 = arith.constant 0 : index
    %101 = vector.load %arg2[%c0_82, %c3, %c0_83, %c0_84] : memref<1x4x16x30xf32, #tpu.memory_space<vmem>>, vector<1x1x16x30xf32>
    %102 = vector.shape_cast %101 : vector<1x1x16x30xf32> to vector<16x30xf32>
    %c0_85 = arith.constant 0 : index
    %c3_86 = arith.constant 3 : index
    %c0_87 = arith.constant 0 : index
    %c0_88 = arith.constant 0 : index
    %103 = vector.load %arg3[%c0_85, %c3_86, %c0_87, %c0_88] : memref<1x4x16x30xf32, #tpu.memory_space<vmem>>, vector<1x1x16x30xf32>
    %104 = vector.shape_cast %103 : vector<1x1x16x30xf32> to vector<16x30xf32>
    %cst_89 = arith.constant dense<0.000000e+00> : vector<16x16xf32>
    %105 = tpu.matmul %102, %104, %cst_89 {dimension_numbers = #tpu.dot_dimension_numbers<[1], [1], [0], [0], [0, 0, 1, 0], [], []>} : vector<16x30xf32>, vector<16x30xf32>, vector<16x16xf32> -> vector<16x16xf32>
    %c0_90 = arith.constant 0 : index
    %c3_91 = arith.constant 3 : index
    %c0_92 = arith.constant 0 : index
    %c0_93 = arith.constant 0 : index
    %106 = vector.load %arg6[%c0_90, %c3_91, %c0_92, %c0_93] : memref<1x4x16x16xbf16, #tpu.memory_space<vmem>>, vector<1x1x16x16xbf16>
    %107 = vector.shape_cast %106 : vector<1x1x16x16xbf16> to vector<16x16xbf16>
    %108 = arith.extf %107 : vector<16x16xbf16> to vector<16x16xf32>
    %109 = arith.addf %105, %108 : vector<16x16xf32>
    %110 = arith.addf %109, %10 : vector<16x16xf32>
    %cst_94 = arith.constant dense<0xFF800000> : vector<16xf32>
    %111 = vector.multi_reduction <maximumf>, %110, %cst_94 [1] : vector<16x16xf32> to vector<16xf32>
    %112 = vector.shape_cast %111 : vector<16xf32> to vector<16x1xf32>
    %113 = vector.broadcast %112 : vector<16x1xf32> to vector<16x16xf32>
    %114 = arith.subf %110, %113 : vector<16x16xf32>
    %115 = math.exp %114 : vector<16x16xf32>
    %cst_95 = arith.constant dense<0.000000e+00> : vector<16xf32>
    %116 = vector.multi_reduction <add>, %115, %cst_95 [1] : vector<16x16xf32> to vector<16xf32>
    %117 = vector.shape_cast %116 : vector<16xf32> to vector<16x1xf32>
    %118 = tpu.reciprocal %117 {approx = true} : vector<16x1xf32> -> vector<16x1xf32>
    %119 = vector.broadcast %118 : vector<16x1xf32> to vector<16x16xf32>
    %120 = arith.mulf %115, %119 : vector<16x16xf32>
    %c0_96 = arith.constant 0 : index
    %c3_97 = arith.constant 3 : index
    %c0_98 = arith.constant 0 : index
    %121 = vector.load %arg10[%c0_96, %c3_97, %c0_98] : memref<16x4x16xf32, #tpu.memory_space<vmem>>, vector<16x1x16xf32>
    %122 = vector.shape_cast %121 : vector<16x1x16xf32> to vector<16x16xf32>
    %123 = vector.shape_cast %120 : vector<16x16xf32> to vector<16x1x16xf32>
    tpu.vector_store %arg10[%c0_96, %c3_97, %c0_98], %123 {strides = array<i32>} : memref<16x4x16xf32, #tpu.memory_space<vmem>>, vector<16x1x16xf32>,
    %124 = arith.truncf %120 : vector<16x16xf32> to vector<16x16xbf16>
    %c0_99 = arith.constant 0 : index
    %c3_100 = arith.constant 3 : index
    %c0_101 = arith.constant 0 : index
    %c0_102 = arith.constant 0 : index
    %125 = vector.load %arg7[%c0_99, %c3_100, %c0_101, %c0_102] : memref<1x4x16x40xbf16, #tpu.memory_space<vmem>>, vector<1x1x16x40xbf16>
    %126 = vector.shape_cast %125 : vector<1x1x16x40xbf16> to vector<16x40xbf16>
    %cst_103 = arith.constant dense<0.000000e+00> : vector<16x40xf32>
    %127 = tpu.matmul %124, %126, %cst_103 {dimension_numbers = #tpu.dot_dimension_numbers<[1], [0], [0], [1], [0, 0, 1, 1], [], []>} : vector<16x16xbf16>, vector<16x40xbf16>, vector<16x40xf32> -> vector<16x40xf32>
    %c0_104 = arith.constant 0 : index
    %c3_105 = arith.constant 3 : index
    %c0_106 = arith.constant 0 : index
    %128 = vector.load %arg11[%c0_104, %c3_105, %c0_106] : memref<16x4x40xf32, #tpu.memory_space<vmem>>, vector<16x1x40xf32>
    %129 = vector.shape_cast %128 : vector<16x1x40xf32> to vector<16x40xf32>
    %130 = vector.shape_cast %127 : vector<16x40xf32> to vector<16x1x40xf32>
    tpu.vector_store %arg11[%c0_104, %c3_105, %c0_106], %130 {strides = array<i32>} : memref<16x4x40xf32, #tpu.memory_space<vmem>>, vector<16x1x40xf32>,
    %c0_107 = arith.constant 0 : index
    %c0_108 = arith.constant 0 : index
    %c0_109 = arith.constant 0 : index
    %131 = vector.load %arg10[%c0_107, %c0_108, %c0_109] : memref<16x4x16xf32, #tpu.memory_space<vmem>>, vector<16x4x16xf32>
    %132 = arith.truncf %131 : vector<16x4x16xf32> to vector<16x4x16xbf16>
    %c0_110 = arith.constant 0 : index
    %c0_111 = arith.constant 0 : index
    %c0_112 = arith.constant 0 : index
    %c0_113 = arith.constant 0 : index
    %133 = vector.load %arg8[%c0_110, %c0_111, %c0_112, %c0_113] : memref<1x16x16x16xbf16, #tpu.memory_space<vmem>>, vector<1x16x16x16xbf16>
    %134 = vector.shape_cast %133 : vector<1x16x16x16xbf16> to vector<16x16x16xbf16>
    %cst_114 = arith.constant dense<0.000000e+00> : vector<16x4x16xf32>
    %135 = tpu.matmul %132, %134, %cst_114 {dimension_numbers = #tpu.dot_dimension_numbers<[2], [1], [1], [2], [0, 0, 0, 1, 1, 2], [0], [0]>} : vector<16x4x16xbf16>, vector<16x16x16xbf16>, vector<16x4x16xf32> -> vector<16x4x16xf32>
    %c0_115 = arith.constant 0 : index
    %c0_116 = arith.constant 0 : index
    %c0_117 = arith.constant 0 : index
    %136 = vector.load %arg11[%c0_115, %c0_116, %c0_117] : memref<16x4x40xf32, #tpu.memory_space<vmem>>, vector<16x4x40xf32>
    %cst_118 = arith.constant 0.000000e+00 : f32
    %137 = vector.broadcast %cst_118 : f32 to vector<16x4x72xf32>
    %138 = tpu.concatenate %136, %135, %137 in 2 : vector<16x4x40xf32>, vector<16x4x16xf32>, vector<16x4x72xf32> -> vector<16x4x128xf32>
    %c0_119 = arith.constant 0 : index
    %c0_120 = arith.constant 0 : index
    %c0_121 = arith.constant 0 : index
    %c0_122 = arith.constant 0 : index
    %139 = vector.load %arg9[%c0_119, %c0_120, %c0_121, %c0_122] : memref<1x16x4x128xf32, #tpu.memory_space<vmem>>, vector<1x16x4x128xf32>
    %140 = vector.shape_cast %139 : vector<1x16x4x128xf32> to vector<16x4x128xf32>
    %141 = vector.shape_cast %138 : vector<16x4x128xf32> to vector<1x16x4x128xf32>
    tpu.vector_store %arg9[%c0_119, %c0_120, %c0_121, %c0_122], %141 {strides = array<i32>} : memref<1x16x4x128xf32, #tpu.memory_space<vmem>>, vector<1x16x4x128xf32>,
    return
  }
  func.func @transform_0(%arg0: i32, %arg1: i32) -> (i32, i32, i32, i32) {
    %c0_i32 = arith.constant 0 : i32
    %c0_i32_0 = arith.constant 0 : i32
    %c0_i32_1 = arith.constant 0 : i32
    return %arg0, %c0_i32, %arg1, %c0_i32_0 : i32, i32, i32, i32
  }
  func.func @transform_1(%arg0: i32, %arg1: i32) -> (i32, i32, i32, i32) {
    %c0_i32 = arith.constant 0 : i32
    %c0_i32_0 = arith.constant 0 : i32
    %c0_i32_1 = arith.constant 0 : i32
    %c0_i32_2 = arith.constant 0 : i32
    return %arg0, %c0_i32, %c0_i32_0, %c0_i32_1 : i32, i32, i32, i32
  }
  func.func @transform_2(%arg0: i32, %arg1: i32) -> (i32, i32, i32) {
    %c0_i32 = arith.constant 0 : i32
    %c0_i32_0 = arith.constant 0 : i32
    return %arg0, %arg1, %c0_i32 : i32, i32, i32
  }
  func.func @transform_3(%arg0: i32, %arg1: i32) -> (i32, i32, i32) {
    %c0_i32 = arith.constant 0 : i32
    %c0_i32_0 = arith.constant 0 : i32
    %c0_i32_1 = arith.constant 0 : i32
    return %arg0, %c0_i32, %c0_i32_0 : i32, i32, i32
  }
  func.func @transform_4(%arg0: i32, %arg1: i32) -> (i32, i32, i32, i32) {
    %c0_i32 = arith.constant 0 : i32
    %c0_i32_0 = arith.constant 0 : i32
    %c0_i32_1 = arith.constant 0 : i32
    return %arg0, %c0_i32, %arg1, %c0_i32_0 : i32, i32, i32, i32
  }
  func.func @transform_5(%arg0: i32, %arg1: i32) -> (i32, i32, i32, i32) {
    %c0_i32 = arith.constant 0 : i32
    %c0_i32_0 = arith.constant 0 : i32
    %c0_i32_1 = arith.constant 0 : i32
    %c0_i32_2 = arith.constant 0 : i32
    return %arg0, %c0_i32, %c0_i32_0, %c0_i32_1 : i32, i32, i32, i32
  }
  func.func @transform_6(%arg0: i32, %arg1: i32) -> (i32, i32, i32, i32) {
    %c0_i32 = arith.constant 0 : i32
    %c0_i32_0 = arith.constant 0 : i32
    %c0_i32_1 = arith.constant 0 : i32
    return %arg0, %arg1, %c0_i32, %c0_i32_0 : i32, i32, i32, i32
  }
  func.func @transform_7(%arg0: i32, %arg1: i32) -> (i32, i32, i32, i32) {
    %c0_i32 = arith.constant 0 : i32
    %c0_i32_0 = arith.constant 0 : i32
    %c0_i32_1 = arith.constant 0 : i32
    return %arg0, %arg1, %c0_i32, %c0_i32_0 : i32, i32, i32, i32
  }
}

</mosaic_0001>

<bundles_post_ra>
// kernel: invariant_point_attention.1
= control target key start
LH: loop header
LB: loop body
LE: loop exit
PB: predicated region body
PF: predicated region fallthrough
CT: control target
= control target key end

     0   :  { %s2320_s24 = smov 0   ;;  %s2322_s25 = smov 0   ;;  %s2741_s0 = inlined_call_operand.vmem [shape: f32[2,4,16,30], index: 0, kind: input, shape index: {}]   ;;  %s2742_s1 = inlined_call_operand.vmem [shape: f32[2,4,16,30], index: 1, kind: input, shape index: {}]   ;;  %s2743_s2 = inlined_call_operand.vmem [shape: f32[2,16,1], index: 2, kind: input, shape index: {}]   ;;  %s2744_s3 = inlined_call_operand.vmem [shape: f32[2,1,16], index: 3, kind: input, shape index: {}]   ;;  %s2745_s4 = inlined_call_operand.vmem [shape: bf16[2,4,16,16], index: 4, kind: input, shape index: {}]   ;;  %s2746_s5 = inlined_call_operand.vmem [shape: bf16[2,4,16,40], index: 5, kind: input, shape index: {}]   ;;  %s2747_s6 = inlined_call_operand.vmem [shape: bf16[2,16,16,16], index: 6, kind: input, shape index: {}]   ;;  %s2748_s7 = inlined_call_operand.vmem [shape: f32[2,16,4,128], index: 7, kind: output, shape index: {}]  }
   0x1   :  { %s2324_s26 = smov 0  }
   0x2 LB: > { %s29_s27 = sadd.s32 1, %s2272_s25  ;;  %p1989_p0 = scmp.ge.s32.totalorder %s2276_s26, 1  ;;  %s2276_s26 = sphi %s2324_s26, %s17_s26   ;;  %s2272_s25 = sphi %s2322_s25, %s2750_s25   ;;  %s2268_s24 = sphi %s2320_s24, %s2749_s24  }
   0x3   : > { %p31_p1 = scmp.ge.s32.totalorder %s29_s27, 2  ;;  %p338_p2 = scmp.lt.s32.totalorder %s2276_s26, 3 }
   0x5   : > { %s2752_s27 = smov (%p31_p1, %s29_s27), 0  ;;  %p339_p3 = pnand %p1989_p0, %p338_p2 }
   0x6   : > { %p420_p4 = scmp.lt.s32.totalorder (!%p339_p3), %s2268_s24, 1 }
   0x7   : > { %342 = sbr.rel (%p339_p3) target bundleno = 1143 (0x477), region = 48 }
   0xc   : > { %v2278_v0 = vmov 0   ;;  %s2754_s24 = smov (!%p420_p4, %s2268_s24), 1  ;;  %vm514_vm0 = vcmask 244736   ;;  %vm552_vm1 = vcmask 130048   ;;  %vm605_vm2 = vcmask 122880  }
   0xd   : > { %2220 = vset.pattern.permute.xlu0 %v2278_v0  ;;  %s2341_s28 = sshll.u32 %s2754_s24, 6  ;;  %s2150_s9 = sshll.u32 %s2754_s24, 4  ;;  %vm678_vm3 = vcmask 319488   ;;  %vm1758_vm4 = vcmask 326656   ;;  %vm1775_vm5 = vcmask 457728  }
   0xe   : > { %s2347_s8 = scalar_lea.vmem %s2742_s1, %s2341_s28  ;;  %s442_s12 = scalar_lea.vmem %s2743_s2, %s2150_s9 }
   0xf   : > { %v509_v1 = vld [vmem:[%s2347_s8 + $0x8] sm:$0xff]  ;;  %v2018_v2 = vld [vmem:[%s2347_s8 + $0x18] sm:$0xff]  ;;  %v508_v3 = vld [vmem:[%s2347_s8] sm:$0xff]  ;;  %s2363_s15 = scalar_lea.vmem %s2741_s0, %s2341_s28  ;;  %s446_s18 = scalar_lea.vmem %s2744_s3, %s2754_s24 }
  0x10   : > { %2006 = vmatpush.xpose.msk.msra.mxu0 %vm514_vm0, %v509_v1  ;;  %2021 = vmatpush.xpose.msk.msra.mxu2 %vm514_vm0, %v2018_v2  ;;  %v2017_v4 = vld [vmem:[%s2347_s8 + $0x10] sm:$0xff]  ;;  %v484_v5 = vld [vmem:[%s442_s12] sm:$0xff]  ;;  %v2052_v6 = vld [vmem:[%s2347_s8 + $0x38] sm:$0xff]  ;;  %s2151_s19 = sshll.u32 %s2754_s24, 5  ;;  %s2682_s14 = scalar_lea.vmem %s2748_s7, %s2341_s28 }
  0x11   : > { %489 = vperm.xlu0 %2220, %v484_v5   ;;  %v506_v7 = vld [vmem:[%s2363_s15] sm:$0xff]  ;;  %v2015_v8 = vld [vmem:[%s2363_s15 + $0x10] sm:$0xff]  ;;  %v485_v10 = vld [vmem:[%s442_s12 + $0x8] sm:$0xff]  ;;  %s2393_s22 = scalar_lea.vmem %s2745_s4, %s2151_s19  ;;  %s2422_s30 = scalar_lea.vmem %s2746_s5, %s2151_s19 }
  0x12   : > { %v2051_v9 = vld [vmem:[%s2347_s8 + $0x30] sm:$0xff]  ;;  %v507_v11 = vld [vmem:[%s2363_s15 + $0x8] sm:$0xff]  ;;  %v2016_v12 = vld [vmem:[%s2363_s15 + $0x18] sm:$0xff] }
  0x13   : > { %v2049_v13 = vld [vmem:[%s2363_s15 + $0x30] sm:$0xff]  ;;  %v2050_v14 = vld [vmem:[%s2363_s15 + $0x38] sm:$0xff]  ;;  %v2221_v15 = vld [vmem:[%s446_s18] ss:$0 sm:$0xff] }
  0x14   : > { %2007 = vmatpush.xpose.msk.msra.mxu0 %vm514_vm0, %v508_v3  ;;  %2022 = vmatpush.xpose.msk.msra.mxu2 %vm514_vm0, %v2017_v4  ;;  %v2176_v18 = vld [vmem:[%s2393_s22] sm:$0xff]   ;;  %v2191_v24 = vld [vmem:[%s2393_s22 + $0x8] sm:$0xff]  }
  0x15   : > { %v2177_v20 = vunpack.c.l.bf16 %v2176_v18  ;;  %v2181_v27 = vunpack.c.l.bf16 %v2191_v24  ;;  %v2178_v31 = vunpack.c.h.bf16 %v2176_v18  ;;  %v2182_v39 = vunpack.c.h.bf16 %v2191_v24  ;;  %v2155_v56 = vld [vmem:[%s2422_s30] sm:$0xff]  ;;  %v2035_v57 = vld [vmem:[%s2347_s8 + $0x28] sm:$0xff] }
  0x16   : > { %641 = vmatpush.bf16.msra.mxu1 %v2155_v56  ;;  %v2034_v58 = vld [vmem:[%s2347_s8 + $0x20] sm:$0xff]  ;;  %s2153_s8 = sshll.u32 %s2754_s24, 7  ;;  %s2279_s24 = smov 40  }
  0x17   : > { %2008 = vmatmul.msk.f32.vlgmr.msra.gmra.mxu0 %vm514_vm0, %v506_v7  ;;  %2023 = vmatmul.msk.f32.vlgmr.msra.gmra.mxu2 %vm514_vm0, %v2015_v8  ;;  %s2520_s11 = scalar_lea.vmem %s2747_s6, %s2153_s8 }
  0x18   : > { %2055 = vmatpush.xpose.msk.msrb.mxu0 %vm514_vm0, %v2052_v6 }
  0x19   : > { %494 = vperm.xlu0 %2220, %v485_v10  }
  0x1a   : > { %2038 = vmatpush.xpose.msk.msrb.mxu1 %vm514_vm0, %v2035_v57 }
  0x1c   : > { %2056 = vmatpush.xpose.msk.msrb.mxu0 %vm514_vm0, %v2051_v9 }
  0x1e   : > { %2039 = vmatpush.xpose.msk.msrb.mxu1 %vm514_vm0, %v2034_v58 }
  0x1f   : > { %2009 = vmatmul.msk.f32.gmra.mxu0 %vm514_vm0, %v507_v11  ;;  %2024 = vmatmul.msk.f32.gmra.mxu2 %vm514_vm0, %v2016_v12 }
  0x27   : > { %2057 = vmatmul.msk.f32.vlgmr.msrb.gmra.mxu0 %vm514_vm0, %v2049_v13 }
  0x2f   : > { %2058 = vmatmul.msk.f32.gmra.mxu0 %vm514_vm0, %v2050_v14 }
  0x83   : > { %v490_v16 = vpop.permute.xlu0 %489 }
  0x84   : > { %v500_v17 = vmul.f32 %v2221_v15, %v490_v16  ;;  %v2032_v16 = vld [vmem:[%s2363_s15 + $0x20] sm:$0xff] }
  0x86   : > { %v2004_v19 = vadd.f32 -1.0, %v500_v17  ;;  %v2033_v17 = vld [vmem:[%s2363_s15 + $0x28] sm:$0xff] }
  0x88   : > { %v2396_v22 = vmul.f32 100000.0, %v2004_v19 }
  0x8b   : > { %v495_v21 = vpop.permute.xlu0 %494 }
  0x8c   : > { %v501_v25 = vmul.f32 %v2221_v15, %v495_v21 }
  0x8e   : > { %v2005_v29 = vadd.f32 -1.0, %v501_v25 }
  0x90   : > { %v2401_v35 = vmul.f32 100000.0, %v2005_v29 }
  0x94   : > { %v544_v23 = vpop.f32.mrf.mxu0 }
  0x95   : > { %v545_v26 = vadd.f32 %v2177_v20, %v544_v23 }
  0x97   : > { %v550_v28 = vadd.f32 %v545_v26, %v2396_v22 }
  0x99   : > { %v553_v30 = vsel %vm552_vm1, %v550_v28, -inf }
  0x9a   : > { %v735_v32 = vpop.f32.mrf.mxu2  ;;  %554 = vmax.xlane.f32.xlu1 %v553_v30 }
  0x9b   : > { %v736_v33 = vadd.f32 %v2181_v27, %v735_v32  ;;  %v2192_v32 = vld [vmem:[%s2393_s22 + $0x10] sm:$0xff]  }
  0x9c   : > { %v547_v34 = vpop.f32.mrf.mxu0 }
  0x9d   : > { %v548_v36 = vadd.f32 %v2178_v31, %v547_v34  ;;  %v2404_v37 = vadd.f32 %v736_v33, %v2396_v22 }
  0x9f   : > { %v743_v38 = vsel %vm552_vm1, %v2404_v37, -inf  ;;  %v551_v40 = vadd.f32 %v548_v36, %v2401_v35 }
  0xa0   : > { %744 = vmax.xlane.f32.xlu0 %v743_v38  ;;  %v2185_v38 = vunpack.c.l.bf16 %v2192_v32 }
  0xa1   : > { %v556_v41 = vsel %vm552_vm1, %v551_v40, -inf }
  0xa2   : > { %v738_v42 = vpop.f32.mrf.mxu2  ;;  %557 = vmax.xlane.f32.xlu1 %v556_v41 }
  0xa3   : > { %v739_v43 = vadd.f32 %v2182_v39, %v738_v42  ;;  %v2193_v39 = vld [vmem:[%s2393_s22 + $0x18] sm:$0xff]  }
  0xa4   : > { %v2189_v42 = vunpack.c.l.bf16 %v2193_v39 }
  0xa5   : > { %v2411_v44 = vadd.f32 %v739_v43, %v2401_v35 }
  0xa7   : > { %v746_v45 = vsel %vm552_vm1, %v2411_v44, -inf }
  0xaa   : > { %747 = vmax.xlane.f32.xlu1 %v746_v45 }
 0x10d   : > { %v555_v46 = vpop.xlane.xlu1 %554 }
 0x10e   : > { %v559_v47 = vsub.f32 %v550_v28, %v555_v46 }
 0x110   : > { %v561_v48 = vmul.f32 1.442695, %v559_v47 }
 0x112   : > { %2222 = vpow2.f32 %v561_v48 }
 0x113   : > { %v745_v43 = vpop.xlane.xlu0 %744 }
 0x114   : > { %v749_v47 = vsub.f32 %v2404_v37, %v745_v43 }
 0x115   : > { %v558_v49 = vpop.xlane.xlu1 %557 }
 0x116   : > { %v560_v50 = vsub.f32 %v551_v40, %v558_v49  ;;  %v1113_v40 = vpop.f32.mrf.mxu0 }
 0x117   : > { %v1114_v48 = vadd.f32 %v2189_v42, %v1113_v40 }
 0x118   : > { %v2223_v51 = vpop.eup %2222  ;;  %v563_v52 = vmul.f32 1.442695, %v560_v50  ;;  %v2186_v50 = vunpack.c.h.bf16 %v2192_v32 }
 0x119   : > { %v565_v53 = vsel %vm552_vm1, %v2223_v51, 0.0  ;;  %v1119_v56 = vadd.f32 %v1114_v48, %v2396_v22  ;;  %v2157_v48 = vld [vmem:[%s2422_s30 + $0x10] sm:$0xff] }
 0x11a   : > { %2224 = vpow2.f32 %v563_v52  ;;  %566 = vadd.xlane.f32.xlu2 %v565_v53  ;;  %v2190_v53 = vunpack.c.h.bf16 %v2193_v39 }
 0x11e   : > { %v1116_v57 = vpop.f32.mrf.mxu0 }
 0x120   : > { %v2225_v54 = vpop.eup %2224 }
 0x121   : > { %v568_v55 = vsel %vm552_vm1, %v2225_v54, 0.0 }
 0x122   : > { %569 = vadd.xlane.f32.xlu2 %v568_v55 }
 0x18d   : > { %v567_v59 = vpop.xlane.xlu2 %566 }
 0x18e   : > { %2226 = vrcp.f32 %v567_v59 }
 0x194   : > { %v2227_v60 = vpop.eup %2226 }
 0x195   : > { %v573_v61 = vmul.f32 %v2227_v60, %v2223_v51  ;;  %v570_v62 = vpop.xlane.xlu2 %569  ;;  %v751_v51 = vmul.f32 1.442695, %v749_v47  ;;  %v1117_v60 = vadd.f32 %v2190_v53, %v1116_v57  ;;  %v2162_v53 = vld [vmem:[%s2520_s11 + $0x18] sm:$0xff] }
 0x196   : > { %2228 = vrcp.f32 %v570_v62 }
 0x197   : > { %606 = vst.msk [vmem:[#allocation2] sm:$0x1] %vm605_vm2, %v573_v61  ;;  %v578_v63 = vrot.slane %v573_v61, 2  ;;  %v577_v0 = vrot.slane %v573_v61, 1  ;;  %v579_v1 = vrot.slane %v573_v61, 3  ;;  %v580_v2 = vrot.slane %v573_v61, 4 }
 0x198   : > { %v582_v3 = vrot.slane %v573_v61, 6  ;;  %v581_v4 = vrot.slane %v573_v61, 5  ;;  %v583_v6 = vrot.slane %v573_v61, 7  ;;  %2230 = vpow2.f32 %v751_v51  ;;  %v2160_v51 = vld [vmem:[%s2520_s11 + $0x8] sm:$0xff] }
 0x199   : > { %608 = vst.msk [vmem:[#allocation2 + $0x8] sm:$0x1] %vm605_vm2, %v578_v63  ;;  %v1120_v63 = vadd.f32 %v1117_v60, %v2401_v35 }
 0x19a   : > { %607 = vst.msk [vmem:[#allocation2 + $0x4] sm:$0x1] %vm605_vm2, %v577_v0 }
 0x19b   : > { %609 = vst.msk [vmem:[#allocation2 + $0xc] sm:$0x1] %vm605_vm2, %v579_v1 }
 0x19c   : > { %v2229_v5 = vpop.eup %2228  ;;  %610 = vst.msk [vmem:[#allocation2 + $0x10] sm:$0x1] %vm605_vm2, %v580_v2 }
 0x19d   : > { %v574_v7 = vmul.f32 %v2229_v5, %v2225_v54  ;;  %612 = vst.msk [vmem:[#allocation2 + $0x18] sm:$0x1] %vm605_vm2, %v582_v3  ;;  %v748_v54 = vpop.xlane.xlu1 %747 }
 0x19e   : > { %611 = vst.msk [vmem:[#allocation2 + $0x14] sm:$0x1] %vm605_vm2, %v581_v4  ;;  %v750_v59 = vsub.f32 %v2411_v44, %v748_v54  ;;  %v2231_v0 = vpop.eup %2230  ;;  %v2156_v4 = vld [vmem:[%s2422_s30 + $0x8] sm:$0xff]  ;;  %v2163_v54 = vld [vmem:[%s2520_s11 + $0x20] sm:$0xff] }
 0x19f   : > { %v622_v8 = vpack.c.bf16 %v574_v7, %v573_v61  ;;  %614 = vst.msk [vmem:[#allocation2 + $0x20] sm:$0x1] %vm605_vm2, %v574_v7  ;;  %v585_v9 = vrot.slane %v574_v7, 2  ;;  %v584_v10 = vrot.slane %v574_v7, 1  ;;  %v586_v11 = vrot.slane %v574_v7, 3  ;;  %831 = vmatpush.bf16.msra.mxu3 %v2156_v4 }
 0x1a0   : > { %613 = vst.msk [vmem:[#allocation2 + $0x1c] sm:$0x1] %vm605_vm2, %v583_v6  ;;  %v587_v12 = vrot.slane %v574_v7, 4  ;;  %v589_v13 = vrot.slane %v574_v7, 6  ;;  %v588_v14 = vrot.slane %v574_v7, 5  ;;  %v590_v15 = vrot.slane %v574_v7, 7 }
 0x1a1   : > { %2014 = vmatmul.msk.bf16.vlgmr.msra.gmra.mxu1 %vm552_vm1, %v622_v8  ;;  %616 = vst.msk [vmem:[#allocation2 + $0x28] sm:$0x1] %vm605_vm2, %v585_v9  ;;  %v1121_v61 = vsel %vm552_vm1, %v1119_v56, -inf  ;;  %v753_v62 = vmul.f32 1.442695, %v750_v59  ;;  %v755_v1 = vsel %vm552_vm1, %v2231_v0, 0.0 }
 0x1a2   : > { %615 = vst.msk [vmem:[#allocation2 + $0x24] sm:$0x1] %vm605_vm2, %v584_v10 }
 0x1a3   : > { %617 = vst.msk [vmem:[#allocation2 + $0x2c] sm:$0x1] %vm605_vm2, %v586_v11  ;;  %2232 = vpow2.f32 %v753_v62  ;;  %1020 = vmatpush.bf16.msrb.mxu3 %v2157_v48 }
 0x1a4   : > { %618 = vst.msk [vmem:[#allocation2 + $0x30] sm:$0x1] %vm605_vm2, %v587_v12 }
 0x1a5   : > { %620 = vst.msk [vmem:[#allocation2 + $0x38] sm:$0x1] %vm605_vm2, %v589_v13 }
 0x1a6   : > { %619 = vst.msk [vmem:[#allocation2 + $0x34] sm:$0x1] %vm605_vm2, %v588_v14 }
 0x1a7   : > { %621 = vst.msk [vmem:[#allocation2 + $0x3c] sm:$0x1] %vm605_vm2, %v590_v15 }
 0x1a9   : > { %v2233_v44 = vpop.eup %2232 }
 0x1aa   : > { %v758_v2 = vsel %vm552_vm1, %v2233_v44, 0.0 }
 0x1b1   : > { %2040 = vmatmul.msk.f32.vlgmr.msrb.gmra.mxu1 %vm514_vm0, %v2032_v16 }
 0x1b9   : > { %2041 = vmatmul.msk.f32.gmra.mxu1 %vm514_vm0, %v2033_v17 }
 0x21e   : > { %v643_v18 = vpop.f32.mrf.mxu1 }
 0x21f   : > { %v650_v19 = vrot.slane %v643_v18, 1  ;;  %v651_v20 = vrot.slane %v643_v18, 2  ;;  %v652_v21 = vrot.slane %v643_v18, 3  ;;  %679 = vst.msk [vmem:[#allocation3] sm:$0x1] %vm678_vm3, %v643_v18  ;;  %v653_v23 = vrot.slane %v643_v18, 4 }
 0x220   : > { %v654_v24 = vrot.slane %v643_v18, 5  ;;  %v655_v25 = vrot.slane %v643_v18, 6  ;;  %v656_v26 = vrot.slane %v643_v18, 7 }
 0x221   : > { %680 = vst.msk [vmem:[#allocation3 + $0x4] sm:$0x1] %vm678_vm3, %v650_v19 }
 0x222   : > { %681 = vst.msk [vmem:[#allocation3 + $0x8] sm:$0x1] %vm678_vm3, %v651_v20 }
 0x223   : > { %682 = vst.msk [vmem:[#allocation3 + $0xc] sm:$0x1] %vm678_vm3, %v652_v21 }
 0x224   : > { %683 = vst.msk [vmem:[#allocation3 + $0x10] sm:$0x1] %vm678_vm3, %v653_v23 }
 0x225   : > { %684 = vst.msk [vmem:[#allocation3 + $0x14] sm:$0x1] %vm678_vm3, %v654_v24 }
 0x226   : > { %685 = vst.msk [vmem:[#allocation3 + $0x18] sm:$0x1] %vm678_vm3, %v655_v25  ;;  %v645_v27 = vpop.f32.mrf.mxu1 }
 0x227   : > { %686 = vst.msk [vmem:[#allocation3 + $0x1c] sm:$0x1] %vm678_vm3, %v656_v26  ;;  %v657_v28 = vrot.slane %v645_v27, 1  ;;  %v658_v29 = vrot.slane %v645_v27, 2  ;;  %v659_v30 = vrot.slane %v645_v27, 3  ;;  %v660_v31 = vrot.slane %v645_v27, 4 }
 0x228   : > { %687 = vst.msk [vmem:[#allocation3 + $0x20] sm:$0x1] %vm678_vm3, %v645_v27  ;;  %v661_v33 = vrot.slane %v645_v27, 5  ;;  %v662_v34 = vrot.slane %v645_v27, 6  ;;  %v663_v36 = vrot.slane %v645_v27, 7 }
 0x229   : > { %688 = vst.msk [vmem:[#allocation3 + $0x24] sm:$0x1] %vm678_vm3, %v657_v28 }
 0x22a   : > { %689 = vst.msk [vmem:[#allocation3 + $0x28] sm:$0x1] %vm678_vm3, %v658_v29 }
 0x22b   : > { %690 = vst.msk [vmem:[#allocation3 + $0x2c] sm:$0x1] %vm678_vm3, %v659_v30 }
 0x22c   : > { %691 = vst.msk [vmem:[#allocation3 + $0x30] sm:$0x1] %vm678_vm3, %v660_v31 }
 0x22d   : > { %692 = vst.msk [vmem:[#allocation3 + $0x34] sm:$0x1] %vm678_vm3, %v661_v33 }
 0x22e   : > { %693 = vst.msk [vmem:[#allocation3 + $0x38] sm:$0x1] %vm678_vm3, %v662_v34  ;;  %v924_v41 = vpop.f32.mrf.mxu1 }
 0x22f   : > { %694 = vst.msk [vmem:[#allocation3 + $0x3c] sm:$0x1] %vm678_vm3, %v663_v36  ;;  %v925_v45 = vadd.f32 %v2185_v38, %v924_v41 }
 0x231   : > { %v930_v46 = vadd.f32 %v925_v45, %v2396_v22  ;;  %v1124_v22 = vsel %vm552_vm1, %v1120_v63, -inf }
 0x233   : > { %v932_v49 = vsel %vm552_vm1, %v930_v46, -inf }
 0x234   : > { %933 = vmax.xlane.f32.xlu2 %v932_v49  ;;  %v2158_v49 = vld [vmem:[%s2422_s30 + $0x18] sm:$0xff] }
 0x235   : > { %1209 = vmatpush.bf16.msrb.mxu2 %v2158_v49 }
 0x236   : > { %v927_v52 = vpop.f32.mrf.mxu1 }
 0x237   : > { %v928_v55 = vadd.f32 %v2186_v50, %v927_v52  ;;  %v2159_v50 = vld [vmem:[%s2520_s11] sm:$0xff]  ;;  %v2161_v52 = vld [vmem:[%s2520_s11 + $0x10] sm:$0xff] }
 0x238   : > { %1342 = vmatpush.bf16.msra.mxu1 %v2159_v50  ;;  %1386 = vmatpush.bf16.msra.mxu0 %v2161_v52  ;;  %v2171_v50 = vld [vmem:[%s2520_s11 + $0x60] sm:$0xff] }
 0x239   : > { %v931_v58 = vadd.f32 %v928_v55, %v2401_v35  ;;  %1408 = vmatpush.bf16.msra.mxu2 %v2162_v53  ;;  %v2170_v53 = vld [vmem:[%s2520_s11 + $0x58] sm:$0xff] }
 0x23b   : > { %v935_v37 = vsel %vm552_vm1, %v931_v58, -inf }
 0x23c   : > { %936 = vmax.xlane.f32.xlu1 %v935_v37  ;;  %1122 = vmax.xlane.f32.xlu2 %v1121_v61 }
 0x23d   : > { %1430 = vmatpush.bf16.msrb.mxu1 %v2163_v54 }
 0x244   : > { %1125 = vmax.xlane.f32.xlu1 %v1124_v22  ;;  %756 = vadd.xlane.f32.xlu2 %v755_v1  ;;  %v2165_v1 = vld [vmem:[%s2520_s11 + $0x30] sm:$0xff] }
 0x245   : > { %1474 = vmatpush.bf16.msrb.mxu0 %v2165_v1 }
 0x24c   : > { %759 = vadd.xlane.f32.xlu1 %v758_v2 }
 0x2a7   : > { %v934_v3 = vpop.xlane.xlu2 %933 }
 0x2a8   : > { %v938_v5 = vsub.f32 %v930_v46, %v934_v3 }
 0x2aa   : > { %v940_v6 = vmul.f32 1.442695, %v938_v5 }
 0x2ac   : > { %2234 = vpow2.f32 %v940_v6 }
 0x2af   : > { %v1123_v7 = vpop.xlane.xlu2 %1122  ;;  %v937_v35 = vpop.xlane.xlu1 %936 }
 0x2b0   : > { %v1127_v8 = vsub.f32 %v1119_v56, %v1123_v7  ;;  %v939_v9 = vsub.f32 %v931_v58, %v937_v35  ;;  %v2164_v7 = vld [vmem:[%s2520_s11 + $0x28] sm:$0xff] }
 0x2b2   : > { %v2481_v10 = vpop.eup %2234  ;;  %v1129_v11 = vmul.f32 1.442695, %v1127_v8  ;;  %v942_v12 = vmul.f32 1.442695, %v939_v9 }
 0x2b3   : > { %v944_v13 = vsel %vm552_vm1, %v2481_v10, 0.0 }
 0x2b4   : > { %2236 = vpow2.f32 %v1129_v11  ;;  %945 = vadd.xlane.f32.xlu2 %v944_v13 }
 0x2b5   : > { %2238 = vpow2.f32 %v942_v12 }
 0x2b7   : > { %v757_v14 = vpop.xlane.xlu2 %756  ;;  %v1126_v15 = vpop.xlane.xlu1 %1125 }
 0x2b8   : > { %2240 = vrcp.f32 %v757_v14  ;;  %v1128_v16 = vsub.f32 %v1120_v63, %v1126_v15 }
 0x2ba   : > { %v2485_v17 = vpop.eup %2236  ;;  %v1131_v18 = vmul.f32 1.442695, %v1128_v16 }
 0x2bb   : > { %v2487_v19 = vpop.eup %2238  ;;  %v1133_v20 = vsel %vm552_vm1, %v2485_v17, 0.0 }
 0x2bc   : > { %2242 = vpow2.f32 %v1131_v18  ;;  %1134 = vadd.xlane.f32.xlu2 %v1133_v20  ;;  %v947_v21 = vsel %vm552_vm1, %v2487_v19, 0.0  ;;  %v2166_v20 = vld [vmem:[%s2520_s11 + $0x38] sm:$0xff] }
 0x2bd   : > { %948 = vadd.xlane.f32.xlu1 %v947_v21 }
 0x2be   : > { %v2241_v23 = vpop.eup %2240 }
 0x2bf   : > { %v763_v24 = vmul.f32 %v2241_v23, %v2231_v0  ;;  %v760_v25 = vpop.xlane.xlu1 %759 }
 0x2c0   : > { %2244 = vrcp.f32 %v760_v25  ;;  %v2169_v25 = vld [vmem:[%s2520_s11 + $0x50] sm:$0xff] }
 0x2c1   : > { %795 = vst.msk [vmem:[#allocation2 + $0x1] sm:$0x1] %vm605_vm2, %v763_v24  ;;  %v768_v26 = vrot.slane %v763_v24, 2  ;;  %v767_v27 = vrot.slane %v763_v24, 1  ;;  %v769_v28 = vrot.slane %v763_v24, 3  ;;  %v770_v30 = vrot.slane %v763_v24, 4 }
 0x2c2   : > { %v2494_v29 = vpop.eup %2242  ;;  %v772_v32 = vrot.slane %v763_v24, 6  ;;  %v771_v33 = vrot.slane %v763_v24, 5  ;;  %v773_v36 = vrot.slane %v763_v24, 7 }
 0x2c3   : > { %v1136_v31 = vsel %vm552_vm1, %v2494_v29, 0.0  ;;  %797 = vst.msk [vmem:[#allocation2 + $0x9] sm:$0x1] %vm605_vm2, %v768_v26 }
 0x2c4   : > { %796 = vst.msk [vmem:[#allocation2 + $0x5] sm:$0x1] %vm605_vm2, %v767_v27 }
 0x2c5   : > { %1137 = vadd.xlane.f32.xlu1 %v1136_v31  ;;  %798 = vst.msk [vmem:[#allocation2 + $0xd] sm:$0x1] %vm605_vm2, %v769_v28 }
 0x2c6   : > { %v2245_v34 = vpop.eup %2244  ;;  %799 = vst.msk [vmem:[#allocation2 + $0x11] sm:$0x1] %vm605_vm2, %v770_v30 }
 0x2c7   : > { %v764_v38 = vmul.f32 %v2245_v34, %v2233_v44  ;;  %801 = vst.msk [vmem:[#allocation2 + $0x19] sm:$0x1] %vm605_vm2, %v772_v32 }
 0x2c8   : > { %800 = vst.msk [vmem:[#allocation2 + $0x15] sm:$0x1] %vm605_vm2, %v771_v33 }
 0x2c9   : > { %v811_v39 = vpack.c.bf16 %v764_v38, %v763_v24  ;;  %803 = vst.msk [vmem:[#allocation2 + $0x21] sm:$0x1] %vm605_vm2, %v764_v38  ;;  %v775_v40 = vrot.slane %v764_v38, 2  ;;  %v774_v41 = vrot.slane %v764_v38, 1  ;;  %v776_v42 = vrot.slane %v764_v38, 3 }
 0x2ca   : > { %802 = vst.msk [vmem:[#allocation2 + $0x1d] sm:$0x1] %vm605_vm2, %v773_v36  ;;  %v777_v43 = vrot.slane %v764_v38, 4  ;;  %v779_v45 = vrot.slane %v764_v38, 6  ;;  %v778_v46 = vrot.slane %v764_v38, 5  ;;  %v780_v47 = vrot.slane %v764_v38, 7 }
 0x2cb   : > { %2031 = vmatmul.msk.bf16.vlgmr.msra.gmra.mxu3 %vm552_vm1, %v811_v39  ;;  %805 = vst.msk [vmem:[#allocation2 + $0x29] sm:$0x1] %vm605_vm2, %v775_v40  ;;  %v2168_v36 = vld [vmem:[%s2520_s11 + $0x48] sm:$0xff] }
 0x2cc   : > { %804 = vst.msk [vmem:[#allocation2 + $0x25] sm:$0x1] %vm605_vm2, %v774_v41  ;;  %1364 = vmatpush.bf16.msra.mxu3 %v2160_v51 }
 0x2cd   : > { %806 = vst.msk [vmem:[#allocation2 + $0x2d] sm:$0x1] %vm605_vm2, %v776_v42 }
 0x2ce   : > { %807 = vst.msk [vmem:[#allocation2 + $0x31] sm:$0x1] %vm605_vm2, %v777_v43 }
 0x2cf   : > { %809 = vst.msk [vmem:[#allocation2 + $0x39] sm:$0x1] %vm605_vm2, %v779_v45 }
 0x2d0   : > { %808 = vst.msk [vmem:[#allocation2 + $0x35] sm:$0x1] %vm605_vm2, %v778_v46 }
 0x2d1   : > { %810 = vst.msk [vmem:[#allocation2 + $0x3d] sm:$0x1] %vm605_vm2, %v780_v47 }
 0x327   : > { %v946_v55 = vpop.xlane.xlu2 %945 }
 0x328   : > { %2246 = vrcp.f32 %v946_v55 }
 0x32e   : > { %v2247_v56 = vpop.eup %2246 }
 0x32f   : > { %v952_v57 = vmul.f32 %v2247_v56, %v2481_v10  ;;  %v1135_v58 = vpop.xlane.xlu2 %1134  ;;  %v2173_v56 = vld [vmem:[%s2520_s11 + $0x70] sm:$0xff] }
 0x330   : > { %2248 = vrcp.f32 %v1135_v58  ;;  %v949_v59 = vpop.xlane.xlu1 %948 }
 0x331   : > { %2250 = vrcp.f32 %v949_v59  ;;  %984 = vst.msk [vmem:[#allocation2 + $0x2] sm:$0x1] %vm605_vm2, %v952_v57  ;;  %v957_v60 = vrot.slane %v952_v57, 2  ;;  %v956_v37 = vrot.slane %v952_v57, 1  ;;  %v958_v61 = vrot.slane %v952_v57, 3 }
 0x332   : > { %v959_v62 = vrot.slane %v952_v57, 4  ;;  %v961_v63 = vrot.slane %v952_v57, 6  ;;  %v960_v0 = vrot.slane %v952_v57, 5  ;;  %v962_v12 = vrot.slane %v952_v57, 7 }
 0x333   : > { %986 = vst.msk [vmem:[#allocation2 + $0xa] sm:$0x1] %vm605_vm2, %v957_v60 }
 0x334   : > { %985 = vst.msk [vmem:[#allocation2 + $0x6] sm:$0x1] %vm605_vm2, %v956_v37 }
 0x335   : > { %987 = vst.msk [vmem:[#allocation2 + $0xe] sm:$0x1] %vm605_vm2, %v958_v61 }
 0x336   : > { %v2249_v22 = vpop.eup %2248  ;;  %988 = vst.msk [vmem:[#allocation2 + $0x12] sm:$0x1] %vm605_vm2, %v959_v62 }
 0x337   : > { %v2251_v44 = vpop.eup %2250  ;;  %v1141_v2 = vmul.f32 %v2249_v22, %v2485_v17  ;;  %990 = vst.msk [vmem:[#allocation2 + $0x1a] sm:$0x1] %vm605_vm2, %v961_v63  ;;  %v2167_v17 = vld [vmem:[%s2520_s11 + $0x40] sm:$0xff]  ;;  %v2172_v22 = vld [vmem:[%s2520_s11 + $0x68] sm:$0xff] }
 0x338   : > { %v2537_v3 = vmul.f32 %v2251_v44, %v2487_v19  ;;  %v1138_v4 = vpop.xlane.xlu1 %1137  ;;  %989 = vst.msk [vmem:[#allocation2 + $0x16] sm:$0x1] %vm605_vm2, %v960_v0 }
 0x339   : > { %2252 = vrcp.f32 %v1138_v4  ;;  %1173 = vst.msk [vmem:[#allocation2 + $0x3] sm:$0x1] %vm605_vm2, %v1141_v2  ;;  %v1146_v5 = vrot.slane %v1141_v2, 2  ;;  %v1145_v6 = vrot.slane %v1141_v2, 1  ;;  %v1147_v35 = vrot.slane %v1141_v2, 3 }
 0x33a   : > { %v1000_v8 = vpack.c.bf16 %v2537_v3, %v952_v57  ;;  %992 = vst.msk [vmem:[#allocation2 + $0x22] sm:$0x1] %vm605_vm2, %v2537_v3  ;;  %v1148_v9 = vrot.slane %v1141_v2, 4  ;;  %v1150_v10 = vrot.slane %v1141_v2, 6  ;;  %v1149_v11 = vrot.slane %v1141_v2, 5 }
 0x33b   : > { %1175 = vst.msk [vmem:[#allocation2 + $0xb] sm:$0x1] %vm605_vm2, %v1146_v5  ;;  %v1151_v14 = vrot.slane %v1141_v2, 7  ;;  %v964_v18 = vrot.slane %v2537_v3, 2  ;;  %v963_v21 = vrot.slane %v2537_v3, 1  ;;  %v966_v31 = vrot.slane %v2537_v3, 4 }
 0x33c   : > { %2048 = vmatmul.msk.bf16.vlgmr.msrb.gmra.mxu3 %vm552_vm1, %v1000_v8  ;;  %1174 = vst.msk [vmem:[#allocation2 + $0x7] sm:$0x1] %vm605_vm2, %v1145_v6  ;;  %v968_v34 = vrot.slane %v2537_v3, 6  ;;  %v967_v40 = vrot.slane %v2537_v3, 5  ;;  %v969_v5 = vrot.slane %v2537_v3, 7 }
 0x33d   : > { %1452 = vmatpush.bf16.msrb.mxu3 %v2164_v7  ;;  %1176 = vst.msk [vmem:[#allocation2 + $0xf] sm:$0x1] %vm605_vm2, %v1147_v35 }
 0x33e   : > { %1177 = vst.msk [vmem:[#allocation2 + $0x13] sm:$0x1] %vm605_vm2, %v1148_v9 }
 0x33f   : > { %v2253_v13 = vpop.eup %2252  ;;  %1179 = vst.msk [vmem:[#allocation2 + $0x1b] sm:$0x1] %vm605_vm2, %v1150_v10  ;;  %v2174_v10 = vld [vmem:[%s2520_s11 + $0x78] sm:$0xff] }
 0x340   : > { %v2552_v15 = vmul.f32 %v2253_v13, %v2494_v29  ;;  %v1262_v16 = vld [vmem:[#allocation2] sm:$0xf]  ;;  %1178 = vst.msk [vmem:[#allocation2 + $0x17] sm:$0x1] %vm605_vm2, %v1149_v11  ;;  %v965_v29 = vrot.slane %v2537_v3, 3 }
 0x341   : > { %v1278_v19 = vpack.c.bf16 %v1262_v16, %v1262_v16  ;;  %991 = vst.msk [vmem:[#allocation2 + $0x1e] sm:$0x1] %vm605_vm2, %v962_v12 }
 0x342   : > { %v1189_v23 = vpack.c.bf16 %v2552_v15, %v1141_v2  ;;  %1181 = vst.msk [vmem:[#allocation2 + $0x23] sm:$0x1] %vm605_vm2, %v2552_v15  ;;  %v1264_v24 = vld [vmem:[#allocation2 + $0x8] sm:$0xf]  ;;  %v1153_v26 = vrot.slane %v2552_v15, 2  ;;  %v1152_v28 = vrot.slane %v2552_v15, 1 }
 0x343   : > { %2070 = vmatmul.msk.bf16.vlgmr.msra.gmra.mxu1 %vm552_vm1, %v1278_v19  ;;  %v1280_v27 = vpack.c.bf16 %v1264_v24, %v1264_v24  ;;  %1180 = vst.msk [vmem:[#allocation2 + $0x1f] sm:$0x1] %vm605_vm2, %v1151_v14  ;;  %v1154_v30 = vrot.slane %v2552_v15, 3  ;;  %v1263_v32 = vld [vmem:[#allocation2 + $0x4] sm:$0xf]  ;;  %v1155_v33 = vrot.slane %v2552_v15, 4 }
 0x344   : > { %2065 = vmatmul.msk.bf16.vlgmr.msrb.gmra.mxu2 %vm552_vm1, %v1189_v23  ;;  %1518 = vmatpush.bf16.msra.mxu1 %v2167_v17  ;;  %994 = vst.msk [vmem:[#allocation2 + $0x2a] sm:$0x1] %vm605_vm2, %v964_v18  ;;  %v1157_v38 = vrot.slane %v2552_v15, 6  ;;  %v1279_v39 = vpack.c.bf16 %v1263_v32, %v1263_v32  ;;  %v1265_v42 = vld [vmem:[#allocation2 + $0xc] sm:$0xf]  ;;  %v1156_v4 = vrot.slane %v2552_v15, 5 }
 0x345   : > { %2080 = vmatmul.msk.bf16.vlgmr.msra.gmra.mxu0 %vm552_vm1, %v1280_v27  ;;  %1496 = vmatpush.bf16.msrb.mxu2 %v2166_v20  ;;  %1183 = vst.msk [vmem:[#allocation2 + $0x2b] sm:$0x1] %vm605_vm2, %v1153_v26  ;;  %v1266_v43 = vld [vmem:[#allocation2 + $0x10] sm:$0xf]  ;;  %v1281_v55 = vpack.c.bf16 %v1265_v42, %v1265_v42  ;;  %v1158_v7 = vrot.slane %v2552_v15, 7 }
 0x346   : > { %1562 = vmatpush.bf16.msra.mxu0 %v2169_v25  ;;  %993 = vst.msk [vmem:[#allocation2 + $0x26] sm:$0x1] %vm605_vm2, %v963_v21  ;;  %v1268_v49 = vld [vmem:[#allocation2 + $0x18] sm:$0xf]  ;;  %v1282_v52 = vpack.c.bf16 %v1266_v43, %v1266_v43 }
 0x347   : > { %1182 = vst.msk [vmem:[#allocation2 + $0x27] sm:$0x1] %vm605_vm2, %v1152_v28  ;;  %v1284_v58 = vpack.c.bf16 %v1268_v49, %v1268_v49  ;;  %v1267_v60 = vld [vmem:[#allocation2 + $0x14] sm:$0xf] }
 0x348   : > { %995 = vst.msk [vmem:[#allocation2 + $0x2e] sm:$0x1] %vm605_vm2, %v965_v29  ;;  %v1283_v44 = vpack.c.bf16 %v1267_v60, %v1267_v60 }
 0x349   : > { %1184 = vst.msk [vmem:[#allocation2 + $0x2f] sm:$0x1] %vm605_vm2, %v1154_v30  ;;  %v1270_v6 = vld [vmem:[#allocation2 + $0x20] sm:$0xf] }
 0x34a   : > { %996 = vst.msk [vmem:[#allocation2 + $0x32] sm:$0x1] %vm605_vm2, %v966_v31  ;;  %v1269_v35 = vld [vmem:[#allocation2 + $0x1c] sm:$0xf]  ;;  %v1286_v9 = vpack.c.bf16 %v1270_v6, %v1270_v6 }
 0x34b   : > { %1185 = vst.msk [vmem:[#allocation2 + $0x33] sm:$0x1] %vm605_vm2, %v1155_v33  ;;  %v1285_v11 = vpack.c.bf16 %v1269_v35, %v1269_v35 }
 0x34c   : > { %2075 = vmatmul.msk.bf16.vlgmr.msra.gmra.mxu3 %vm552_vm1, %v1279_v39  ;;  %998 = vst.msk [vmem:[#allocation2 + $0x3a] sm:$0x1] %vm605_vm2, %v968_v34  ;;  %v1272_v8 = vld [vmem:[#allocation2 + $0x28] sm:$0xf] }
 0x34d   : > { %1540 = vmatpush.bf16.msra.mxu3 %v2168_v36  ;;  %1187 = vst.msk [vmem:[#allocation2 + $0x3b] sm:$0x1] %vm605_vm2, %v1157_v38  ;;  %v1288_v3 = vpack.c.bf16 %v1272_v8, %v1272_v8 }
 0x34e   : > { %v833_v41 = vpop.f32.mrf.mxu3  ;;  %997 = vst.msk [vmem:[#allocation2 + $0x36] sm:$0x1] %vm605_vm2, %v967_v40  ;;  %v1271_v12 = vld [vmem:[#allocation2 + $0x24] sm:$0xf] }
 0x34f   : > { %v840_v45 = vrot.slane %v833_v41, 1  ;;  %v841_v46 = vrot.slane %v833_v41, 2  ;;  %v842_v47 = vrot.slane %v833_v41, 3  ;;  %868 = vst.msk [vmem:[#allocation3 + $0x1] sm:$0x1] %vm678_vm3, %v833_v41  ;;  %v843_v48 = vrot.slane %v833_v41, 4 }
 0x350   : > { %v844_v51 = vrot.slane %v833_v41, 5  ;;  %v845_v54 = vrot.slane %v833_v41, 6  ;;  %v846_v57 = vrot.slane %v833_v41, 7  ;;  %1186 = vst.msk [vmem:[#allocation2 + $0x37] sm:$0x1] %vm605_vm2, %v1156_v4  ;;  %v1287_v13 = vpack.c.bf16 %v1271_v12, %v1271_v12 }
 0x351   : > { %869 = vst.msk [vmem:[#allocation3 + $0x5] sm:$0x1] %vm678_vm3, %v840_v45  ;;  %v1273_v15 = vld [vmem:[#allocation2 + $0x2c] sm:$0xf] }
 0x352   : > { %870 = vst.msk [vmem:[#allocation3 + $0x9] sm:$0x1] %vm678_vm3, %v841_v46  ;;  %v1274_v14 = vld [vmem:[#allocation2 + $0x30] sm:$0xf]  ;;  %v1289_v18 = vpack.c.bf16 %v1273_v15, %v1273_v15 }
 0x353   : > { %871 = vst.msk [vmem:[#allocation3 + $0xd] sm:$0x1] %vm678_vm3, %v842_v47  ;;  %2090 = vmatmul.msk.bf16.vlgmr.msrb.gmra.mxu1 %vm552_vm1, %v1282_v52  ;;  %v1290_v17 = vpack.c.bf16 %v1274_v14, %v1274_v14 }
 0x354   : > { %872 = vst.msk [vmem:[#allocation3 + $0x11] sm:$0x1] %vm678_vm3, %v843_v48  ;;  %2085 = vmatmul.msk.bf16.vlgmr.msra.gmra.mxu2 %vm552_vm1, %v1281_v55  ;;  %1606 = vmatpush.bf16.msrb.mxu1 %v2171_v50  ;;  %v1276_v16 = vld [vmem:[#allocation2 + $0x38] sm:$0xf] }
 0x355   : > { %873 = vst.msk [vmem:[#allocation3 + $0x15] sm:$0x1] %vm678_vm3, %v844_v51  ;;  %2100 = vmatmul.msk.bf16.vlgmr.msrb.gmra.mxu0 %vm552_vm1, %v1284_v58  ;;  %1584 = vmatpush.bf16.msra.mxu2 %v2170_v53  ;;  %v1292_v19 = vpack.c.bf16 %v1276_v16, %v1276_v16 }
 0x356   : > { %874 = vst.msk [vmem:[#allocation3 + $0x19] sm:$0x1] %vm678_vm3, %v845_v54  ;;  %v835_v59 = vpop.f32.mrf.mxu3  ;;  %1650 = vmatpush.bf16.msrb.mxu0 %v2173_v56 }
 0x357   : > { %875 = vst.msk [vmem:[#allocation3 + $0x1d] sm:$0x1] %vm678_vm3, %v846_v57  ;;  %v847_v37 = vrot.slane %v835_v59, 1  ;;  %v848_v61 = vrot.slane %v835_v59, 2  ;;  %v849_v62 = vrot.slane %v835_v59, 3  ;;  %v850_v63 = vrot.slane %v835_v59, 4 }
 0x358   : > { %876 = vst.msk [vmem:[#allocation3 + $0x21] sm:$0x1] %vm678_vm3, %v835_v59  ;;  %v851_v0 = vrot.slane %v835_v59, 5  ;;  %v852_v1 = vrot.slane %v835_v59, 6  ;;  %v853_v2 = vrot.slane %v835_v59, 7 }
 0x359   : > { %877 = vst.msk [vmem:[#allocation3 + $0x25] sm:$0x1] %vm678_vm3, %v847_v37  ;;  %v1275_v20 = vld [vmem:[#allocation2 + $0x34] sm:$0xf] }
 0x35a   : > { %878 = vst.msk [vmem:[#allocation3 + $0x29] sm:$0x1] %vm678_vm3, %v848_v61  ;;  %v1291_v21 = vpack.c.bf16 %v1275_v20, %v1275_v20 }
 0x35b   : > { %879 = vst.msk [vmem:[#allocation3 + $0x2d] sm:$0x1] %vm678_vm3, %v849_v62 }
 0x35c   : > { %880 = vst.msk [vmem:[#allocation3 + $0x31] sm:$0x1] %vm678_vm3, %v850_v63  ;;  %2095 = vmatmul.msk.bf16.vlgmr.msrb.gmra.mxu3 %vm552_vm1, %v1283_v44 }
 0x35d   : > { %881 = vst.msk [vmem:[#allocation3 + $0x35] sm:$0x1] %vm678_vm3, %v851_v0  ;;  %1628 = vmatpush.bf16.msrb.mxu3 %v2172_v22 }
 0x35e   : > { %882 = vst.msk [vmem:[#allocation3 + $0x39] sm:$0x1] %vm678_vm3, %v852_v1 }
 0x35f   : > { %883 = vst.msk [vmem:[#allocation3 + $0x3d] sm:$0x1] %vm678_vm3, %v853_v2 }
 0x360   : > { %999 = vst.msk [vmem:[#allocation2 + $0x3e] sm:$0x1] %vm605_vm2, %v969_v5 }
 0x361   : > { %1188 = vst.msk [vmem:[#allocation2 + $0x3f] sm:$0x1] %vm605_vm2, %v1158_v7 }
 0x363   : > { %2110 = vmatmul.msk.bf16.vlgmr.msra.gmra.mxu1 %vm552_vm1, %v1286_v9 }
 0x364   : > { %2105 = vmatmul.msk.bf16.vlgmr.msrb.gmra.mxu2 %vm552_vm1, %v1285_v11 }
 0x365   : > { %2120 = vmatmul.msk.bf16.vlgmr.msra.gmra.mxu0 %vm552_vm1, %v1288_v3  ;;  %1672 = vmatpush.bf16.msrb.mxu2 %v2174_v10 }
 0x368   : > { %v1277_v23 = vld [vmem:[#allocation2 + $0x3c] sm:$0xf] }
 0x369   : > { %v1293_v24 = vpack.c.bf16 %v1277_v23, %v1277_v23 }
 0x36c   : > { %2115 = vmatmul.msk.bf16.vlgmr.msra.gmra.mxu3 %vm552_vm1, %v1287_v13 }
 0x373   : > { %2130 = vmatmul.msk.bf16.vlgmr.msrb.gmra.mxu1 %vm552_vm1, %v1290_v17 }
 0x374   : > { %2125 = vmatmul.msk.bf16.vlgmr.msra.gmra.mxu2 %vm552_vm1, %v1289_v18 }
 0x375   : > { %2140 = vmatmul.msk.bf16.vlgmr.msrb.gmra.mxu0 %vm552_vm1, %v1292_v19 }
 0x37c   : > { %2135 = vmatmul.msk.bf16.vlgmr.msrb.gmra.mxu3 %vm552_vm1, %v1291_v21 }
 0x384   : > { %2145 = vmatmul.msk.bf16.vlgmr.msrb.gmra.mxu2 %vm552_vm1, %v1293_v24 }
 0x3bf   : > { %v1022_v25 = vpop.f32.mrf.mxu3 }
 0x3c0   : > { %v1029_v26 = vrot.slane %v1022_v25, 1  ;;  %v1030_v27 = vrot.slane %v1022_v25, 2  ;;  %v1031_v28 = vrot.slane %v1022_v25, 3  ;;  %1057 = vst.msk [vmem:[#allocation3 + $0x2] sm:$0x1] %vm678_vm3, %v1022_v25  ;;  %v1344_v29 = vpop.f32.mrf.mxu1  ;;  %v1032_v30 = vrot.slane %v1022_v25, 4 }
 0x3c1   : > { %1710 = vrot.lane.b32.xlu2 %v1344_v29, %s2279_s24  ;;  %v1033_v31 = vrot.slane %v1022_v25, 5  ;;  %v1034_v33 = vrot.slane %v1022_v25, 6  ;;  %v1035_v34 = vrot.slane %v1022_v25, 7 }
 0x3c2   : > { %1058 = vst.msk [vmem:[#allocation3 + $0x6] sm:$0x1] %vm678_vm3, %v1029_v26  ;;  %v1388_v32 = vpop.f32.mrf.mxu0 }
 0x3c3   : > { %1059 = vst.msk [vmem:[#allocation3 + $0xa] sm:$0x1] %vm678_vm3, %v1030_v27  ;;  %1714 = vrot.lane.b32.xlu1 %v1388_v32, %s2279_s24 }
 0x3c4   : > { %1060 = vst.msk [vmem:[#allocation3 + $0xe] sm:$0x1] %vm678_vm3, %v1031_v28 }
 0x3c5   : > { %1061 = vst.msk [vmem:[#allocation3 + $0x12] sm:$0x1] %vm678_vm3, %v1032_v30 }
 0x3c6   : > { %1062 = vst.msk [vmem:[#allocation3 + $0x16] sm:$0x1] %vm678_vm3, %v1033_v31 }
 0x3c7   : > { %1063 = vst.msk [vmem:[#allocation3 + $0x1a] sm:$0x1] %vm678_vm3, %v1034_v33  ;;  %v1024_v36 = vpop.f32.mrf.mxu3  ;;  %v1211_v38 = vpop.f32.mrf.mxu2 }
 0x3c8   : > { %1064 = vst.msk [vmem:[#allocation3 + $0x1e] sm:$0x1] %vm678_vm3, %v1035_v34  ;;  %v1036_v39 = vrot.slane %v1024_v36, 1  ;;  %v1037_v40 = vrot.slane %v1024_v36, 2  ;;  %v1038_v41 = vrot.slane %v1024_v36, 3  ;;  %v1346_v42 = vpop.f32.mrf.mxu1  ;;  %v1039_v43 = vrot.slane %v1024_v36, 4 }
 0x3c9   : > { %1065 = vst.msk [vmem:[#allocation3 + $0x22] sm:$0x1] %vm678_vm3, %v1024_v36  ;;  %v1040_v45 = vrot.slane %v1024_v36, 5  ;;  %v1041_v47 = vrot.slane %v1024_v36, 6  ;;  %v1042_v48 = vrot.slane %v1024_v36, 7  ;;  %v1218_v49 = vrot.slane %v1211_v38, 1 }
 0x3ca   : > { %1066 = vst.msk [vmem:[#allocation3 + $0x26] sm:$0x1] %vm678_vm3, %v1036_v39  ;;  %v1390_v46 = vpop.f32.mrf.mxu0  ;;  %v1219_v50 = vrot.slane %v1211_v38, 2  ;;  %v1220_v53 = vrot.slane %v1211_v38, 3  ;;  %v1221_v55 = vrot.slane %v1211_v38, 4  ;;  %v1222_v56 = vrot.slane %v1211_v38, 5 }
 0x3cb   : > { %1067 = vst.msk [vmem:[#allocation3 + $0x2a] sm:$0x1] %vm678_vm3, %v1037_v40  ;;  %v1223_v58 = vrot.slane %v1211_v38, 6  ;;  %v1224_v59 = vrot.slane %v1211_v38, 7 }
 0x3cc   : > { %1068 = vst.msk [vmem:[#allocation3 + $0x2e] sm:$0x1] %vm678_vm3, %v1038_v41 }
 0x3cd   : > { %1069 = vst.msk [vmem:[#allocation3 + $0x32] sm:$0x1] %vm678_vm3, %v1039_v43 }
 0x3ce   : > { %1070 = vst.msk [vmem:[#allocation3 + $0x36] sm:$0x1] %vm678_vm3, %v1040_v45 }
 0x3cf   : > { %1071 = vst.msk [vmem:[#allocation3 + $0x3a] sm:$0x1] %vm678_vm3, %v1041_v47  ;;  %v1213_v51 = vpop.f32.mrf.mxu2  ;;  %v1366_v52 = vpop.f32.mrf.mxu3 }
 0x3d0   : > { %1072 = vst.msk [vmem:[#allocation3 + $0x3e] sm:$0x1] %vm678_vm3, %v1042_v48  ;;  %v1432_v54 = vpop.f32.mrf.mxu1  ;;  %v1225_v60 = vrot.slane %v1213_v51, 1  ;;  %v1226_v37 = vrot.slane %v1213_v51, 2  ;;  %v1227_v63 = vrot.slane %v1213_v51, 3  ;;  %v1228_v22 = vrot.slane %v1213_v51, 4 }
 0x3d1   : > { %1246 = vst.msk [vmem:[#allocation3 + $0x3] sm:$0x1] %vm678_vm3, %v1211_v38  ;;  %1718 = vrot.lane.b32.xlu2 %v1432_v54, %s2279_s24  ;;  %v1229_v1 = vrot.slane %v1213_v51, 5  ;;  %v1230_v2 = vrot.slane %v1213_v51, 6  ;;  %v1231_v4 = vrot.slane %v1213_v51, 7 }
 0x3d2   : > { %1247 = vst.msk [vmem:[#allocation3 + $0x7] sm:$0x1] %vm678_vm3, %v1218_v49  ;;  %v1476_v57 = vpop.f32.mrf.mxu0 }
 0x3d3   : > { %1248 = vst.msk [vmem:[#allocation3 + $0xb] sm:$0x1] %vm678_vm3, %v1219_v50 }
 0x3d4   : > { %1249 = vst.msk [vmem:[#allocation3 + $0xf] sm:$0x1] %vm678_vm3, %v1220_v53 }
 0x3d5   : > { %1250 = vst.msk [vmem:[#allocation3 + $0x13] sm:$0x1] %vm678_vm3, %v1221_v55 }
 0x3d6   : > { %1251 = vst.msk [vmem:[#allocation3 + $0x17] sm:$0x1] %vm678_vm3, %v1222_v56 }
 0x3d7   : > { %1252 = vst.msk [vmem:[#allocation3 + $0x1b] sm:$0x1] %vm678_vm3, %v1223_v58  ;;  %v1368_v61 = vpop.f32.mrf.mxu3  ;;  %v1410_v62 = vpop.f32.mrf.mxu2 }
 0x3d8   : > { %1253 = vst.msk [vmem:[#allocation3 + $0x1f] sm:$0x1] %vm678_vm3, %v1224_v59  ;;  %1716 = vrot.lane.b32.xlu0 %v1410_v62, %s2279_s24  ;;  %v1434_v0 = vpop.f32.mrf.mxu1  ;;  %v1678_v26 = vld [vmem:[#allocation3] sm:$0xf] }
 0x3d9   : > { %1254 = vst.msk [vmem:[#allocation3 + $0x23] sm:$0x1] %vm678_vm3, %v1213_v51  ;;  %1722 = vrot.lane.b32.xlu2 %v1476_v57, %s2279_s24 }
 0x3da   : > { %1255 = vst.msk [vmem:[#allocation3 + $0x27] sm:$0x1] %vm678_vm3, %v1225_v60  ;;  %v1478_v44 = vpop.f32.mrf.mxu0  ;;  %v1680_v39 = vld [vmem:[#allocation3 + $0x8] sm:$0xf] }
 0x3db   : > { %1256 = vst.msk [vmem:[#allocation3 + $0x2b] sm:$0x1] %vm678_vm3, %v1226_v37  ;;  %v1681_v43 = vld [vmem:[#allocation3 + $0xc] sm:$0xf] }
 0x3dc   : > { %1257 = vst.msk [vmem:[#allocation3 + $0x2f] sm:$0x1] %vm678_vm3, %v1227_v63  ;;  %v1682_v30 = vld [vmem:[#allocation3 + $0x10] sm:$0xf] }
 0x3dd   : > { %1258 = vst.msk [vmem:[#allocation3 + $0x33] sm:$0x1] %vm678_vm3, %v1228_v22  ;;  %v1683_v44 = vld [vmem:[#allocation3 + $0x14] sm:$0xf] }
 0x3de   : > { %1259 = vst.msk [vmem:[#allocation3 + $0x37] sm:$0x1] %vm678_vm3, %v1229_v1  ;;  %v1684_v34 = vld [vmem:[#allocation3 + $0x18] sm:$0xf] }
 0x3df   : > { %1260 = vst.msk [vmem:[#allocation3 + $0x3b] sm:$0x1] %vm678_vm3, %v1230_v2  ;;  %v1412_v5 = vpop.f32.mrf.mxu2  ;;  %v1454_v6 = vpop.f32.mrf.mxu3  ;;  %v1685_v61 = vld [vmem:[#allocation3 + $0x1c] sm:$0xf] }
 0x3e0   : > { %1261 = vst.msk [vmem:[#allocation3 + $0x3f] sm:$0x1] %vm678_vm3, %v1231_v4  ;;  %1712 = vrot.lane.b32.xlu0 %v1366_v52, %s2279_s24  ;;  %v1520_v7 = vpop.f32.mrf.mxu1  ;;  %v1679_v52 = vld [vmem:[#allocation3 + $0x4] sm:$0xf]  ;;  %v1686_v60 = vld [vmem:[#allocation3 + $0x20] sm:$0xf] }
 0x3e1   : > { %v1687_v55 = vld [vmem:[#allocation3 + $0x24] sm:$0xf] }
 0x3e2   : > { %v1564_v35 = vpop.f32.mrf.mxu0 }
 0x3e4   : > { %v1690_v47 = vld [vmem:[#allocation3 + $0x30] sm:$0xf] }
 0x3e7   : > { %v1456_v8 = vpop.f32.mrf.mxu3  ;;  %v1498_v9 = vpop.f32.mrf.mxu2  ;;  %v1693_v4 = vld [vmem:[#allocation3 + $0x3c] sm:$0xf] }
 0x3e8   : > { %1724 = vrot.lane.b32.xlu1 %v1498_v9, %s2279_s24  ;;  %1726 = vrot.lane.b32.xlu0 %v1520_v7, %s2279_s24  ;;  %v1522_v10 = vpop.f32.mrf.mxu1 }
 0x3ea   : > { %v1566_v11 = vpop.f32.mrf.mxu0 }
 0x3ef   : > { %v1500_v3 = vpop.f32.mrf.mxu2  ;;  %v1542_v12 = vpop.f32.mrf.mxu3 }
 0x3f0   : > { %1720 = vrot.lane.b32.xlu0 %v1454_v6, %s2279_s24  ;;  %1730 = vrot.lane.b32.xlu1 %v1564_v35, %s2279_s24  ;;  %v1608_v13 = vpop.f32.mrf.mxu1  ;;  %v1688_v35 = vld [vmem:[#allocation3 + $0x28] sm:$0xf] }
 0x3f1   : > { %1734 = vrot.lane.b32.xlu2 %v1608_v13, %s2279_s24 }
 0x3f2   : > { %v1652_v14 = vpop.f32.mrf.mxu0 }
 0x3f7   : > { %v1544_v15 = vpop.f32.mrf.mxu3  ;;  %v1586_v16 = vpop.f32.mrf.mxu2 }
 0x3f8   : > { %1732 = vrot.lane.b32.xlu0 %v1586_v16, %s2279_s24  ;;  %v1610_v17 = vpop.f32.mrf.mxu1  ;;  %v1692_v16 = vld [vmem:[#allocation3 + $0x38] sm:$0xf] }
 0x3f9   : > { %1728 = vrot.lane.b32.xlu2 %v1542_v12, %s2279_s24  ;;  %v1689_v12 = vld [vmem:[#allocation3 + $0x2c] sm:$0xf] }
 0x3fa   : > { %v1654_v18 = vpop.f32.mrf.mxu0 }
 0x3fb   : > { %v1691_v18 = vld [vmem:[#allocation3 + $0x34] sm:$0xf] }
 0x3ff   : > { %v1588_v19 = vpop.f32.mrf.mxu2  ;;  %v1630_v20 = vpop.f32.mrf.mxu3 }
 0x400   : > { %1738 = vrot.lane.b32.xlu0 %v1652_v14, %s2279_s24  ;;  %1736 = vrot.lane.b32.xlu1 %v1630_v20, %s2279_s24 }
 0x407   : > { %v1632_v21 = vpop.f32.mrf.mxu3  ;;  %v1674_v23 = vpop.f32.mrf.mxu2 }
 0x408   : > { %1740 = vrot.lane.b32.xlu2 %v1674_v23, %s2279_s24 }
 0x40f   : > { %v1676_v24 = vpop.f32.mrf.mxu2 }
 0x41b   : > { %v1711_v25 = vpop.permute.xlu2 %1710 }
 0x41c   : > { %v1759_v27 = vsel %vm1758_vm4, %v1678_v26, %v1711_v25 }
 0x41d   : > { %v1776_v28 = vsel %vm1775_vm5, %v1759_v27, 0.0 }
 0x41e   : > { %1792 = vst [vmem:[%s2682_s14] sm:$0xf] %v1776_v28 }
 0x42b   : > { %v1719_v29 = vpop.permute.xlu2 %1718 }
 0x42c   : > { %v1763_v31 = vsel %vm1758_vm4, %v1682_v30, %v1719_v29 }
 0x42d   : > { %v1780_v32 = vsel %vm1775_vm5, %v1763_v31, 0.0 }
 0x42e   : > { %1796 = vst [vmem:[%s2682_s14 + $0x10] sm:$0xf] %v1780_v32 }
 0x433   : > { %v1723_v33 = vpop.permute.xlu2 %1722 }
 0x434   : > { %v1765_v36 = vsel %vm1758_vm4, %v1684_v34, %v1723_v33 }
 0x435   : > { %v1782_v38 = vsel %vm1775_vm5, %v1765_v36, 0.0  ;;  %v1715_v40 = vpop.permute.xlu1 %1714 }
 0x436   : > { %1798 = vst [vmem:[%s2682_s14 + $0x18] sm:$0xf] %v1782_v38  ;;  %v1761_v41 = vsel %vm1758_vm4, %v1680_v39, %v1715_v40 }
 0x437   : > { %v1778_v42 = vsel %vm1775_vm5, %v1761_v41, 0.0 }
 0x438   : > { %1794 = vst [vmem:[%s2682_s14 + $0x8] sm:$0xf] %v1778_v42 }
 0x44a   : > { %v1717_v45 = vpop.permute.xlu0 %1716 }
 0x44b   : > { %v1762_v46 = vsel %vm1758_vm4, %v1681_v43, %v1717_v45  ;;  %v1735_v48 = vpop.permute.xlu2 %1734 }
 0x44c   : > { %v1779_v49 = vsel %vm1775_vm5, %v1762_v46, 0.0  ;;  %v1771_v50 = vsel %vm1758_vm4, %v1690_v47, %v1735_v48 }
 0x44d   : > { %1795 = vst [vmem:[%s2682_s14 + $0xc] sm:$0xf] %v1779_v49  ;;  %v1788_v51 = vsel %vm1775_vm5, %v1771_v50, 0.0 }
 0x44e   : > { %1804 = vst [vmem:[%s2682_s14 + $0x30] sm:$0xf] %v1788_v51 }
 0x452   : > { %v1713_v53 = vpop.permute.xlu0 %1712 }
 0x453   : > { %v1760_v54 = vsel %vm1758_vm4, %v1679_v52, %v1713_v53  ;;  %v1729_v56 = vpop.permute.xlu2 %1728 }
 0x454   : > { %v1777_v57 = vsel %vm1775_vm5, %v1760_v54, 0.0  ;;  %v1768_v58 = vsel %vm1758_vm4, %v1687_v55, %v1729_v56 }
 0x455   : > { %1793 = vst [vmem:[%s2682_s14 + $0x4] sm:$0xf] %v1777_v57  ;;  %v1785_v59 = vsel %vm1775_vm5, %v1768_v58, 0.0 }
 0x456   : > { %1801 = vst [vmem:[%s2682_s14 + $0x24] sm:$0xf] %v1785_v59 }
 0x45a   : > { %v1727_v37 = vpop.permute.xlu0 %1726  ;;  %v1725_v62 = vpop.permute.xlu1 %1724 }
 0x45b   : > { %v1767_v63 = vsel %vm1758_vm4, %v1686_v60, %v1727_v37  ;;  %v1766_v0 = vsel %vm1758_vm4, %v1685_v61, %v1725_v62 }
 0x45c   : > { %v1784_v22 = vsel %vm1775_vm5, %v1767_v63, 0.0  ;;  %v1783_v1 = vsel %vm1775_vm5, %v1766_v0, 0.0 }
 0x45d   : > { %1800 = vst [vmem:[%s2682_s14 + $0x20] sm:$0xf] %v1784_v22 }
 0x45e   : > { %1799 = vst [vmem:[%s2682_s14 + $0x1c] sm:$0xf] %v1783_v1 }
 0x462   : > { %v1721_v2 = vpop.permute.xlu0 %1720  ;;  %v1741_v5 = vpop.permute.xlu2 %1740 }
 0x463   : > { %v1764_v6 = vsel %vm1758_vm4, %v1683_v44, %v1721_v2  ;;  %v1774_v7 = vsel %vm1758_vm4, %v1693_v4, %v1741_v5  ;;  %v1731_v8 = vpop.permute.xlu1 %1730 }
 0x464   : > { %v1781_v9 = vsel %vm1775_vm5, %v1764_v6, 0.0  ;;  %v1791_v10 = vsel %vm1775_vm5, %v1774_v7, 0.0  ;;  %v1769_v11 = vsel %vm1758_vm4, %v1688_v35, %v1731_v8 }
 0x465   : > { %1797 = vst [vmem:[%s2682_s14 + $0x14] sm:$0xf] %v1781_v9  ;;  %v1786_v3 = vsel %vm1775_vm5, %v1769_v11, 0.0 }
 0x466   : > { %1807 = vst [vmem:[%s2682_s14 + $0x3c] sm:$0xf] %v1791_v10 }
 0x467   : > { %1802 = vst [vmem:[%s2682_s14 + $0x28] sm:$0xf] %v1786_v3 }
 0x46a   : > { %v1733_v13 = vpop.permute.xlu0 %1732 }
 0x46b   : > { %v1770_v14 = vsel %vm1758_vm4, %v1689_v12, %v1733_v13 }
 0x46c   : > { %v1787_v15 = vsel %vm1775_vm5, %v1770_v14, 0.0 }
 0x46d   : > { %1803 = vst [vmem:[%s2682_s14 + $0x2c] sm:$0xf] %v1787_v15 }
 0x472   : > { %v1739_v17 = vpop.permute.xlu0 %1738  ;;  %v1737_v19 = vpop.permute.xlu1 %1736 }
 0x473   : > { %v1773_v20 = vsel %vm1758_vm4, %v1692_v16, %v1739_v17  ;;  %v1772_v21 = vsel %vm1758_vm4, %v1691_v18, %v1737_v19 }
 0x474   : > { %v1790_v23 = vsel %vm1775_vm5, %v1773_v20, 0.0  ;;  %v1789_v24 = vsel %vm1775_vm5, %v1772_v21, 0.0 }
 0x475   : > { %1806 = vst [vmem:[%s2682_s14 + $0x38] sm:$0xf] %v1790_v23 }
 0x476   : > { %1805 = vst [vmem:[%s2682_s14 + $0x34] sm:$0xf] %v1789_v24 }
 0x477 PF: > { %s17_s26 = sadd.s32 1, %s2276_s26   ;;  %s2749_s24 = smov %s2272_s25 }
 0x478   : > { %p14_p5 = scmp.ge.s32.totalorder %s17_s26, 4   ;;  %s2750_s25 = smov %s2752_s27 }
 0x47a   :  { %16 = sbr.rel (!%p14_p5) target bundleno = 2 (0x2), region = 108 }

</bundles_post_ra>
